<compile_context>
chip_gen: v7x
topology: tpu7x:2x2x1
jax: 0.10.0
libtpu: 0.0.40
codegen_flags: <defaults>
</compile_context>

<pallas_src>
import functools

import jax
import jax.numpy as jnp
from jax.experimental import pallas as pl
from jax.experimental.pallas import tpu as pltpu

KH, KW = 3, 3          # kernel_size=3
STRIDE = 1             # stride=1
PAD = 0                # padding=0
CIN, COUT = 3, 6
COUT_PAD = 8           # pad output channels to a full sublane group


def _round_up(x, m):
    return (x + m - 1) // m * m


def _grid_steps_for_batch(n):
    """Grid steps for the batch axis.

    Single-TC parts (v5e/v6e): 1 step (whole batch) -- fixed per-step overhead
    dominates this tiny kernel, so fewer steps is the biggest lever.
    Dual-TC parts (v7x): 2 steps so the "parallel" batch axis shards across
    both TensorCores.
    """
    try:
        kind = jax.devices()[0].device_kind.lower()
    except Exception:
        kind = ""
    dual_tc = ("v7" in kind) or ("7x" in kind)
    if dual_tc and n >= 2 and n % 2 == 0:
        return 2
    return 1


def pack_conv_params(weight_oihw, bias, spatial_hw):
    """One-time packing of Conv2d params into the kernel-native layout.

    Call once at parameter-load time, NOT per forward (keeps the transpose /
    pad / lane-splat off the per-call critical path).

    Returns:
      w_splat: (KH*KW*CIN, COUT_PAD, HW_OUT) with
               w_splat[(kh*KW+kw)*CIN+ci, co, :] == weight[co, ci, kh, kw]
      b_splat: (COUT_PAD, HW_OUT), bias broadcast along lanes.
    """
    H, W = spatial_hw
    hw_out = _round_up(H * W, 128)
    cout, cin, kh, kw = weight_oihw.shape
    ktaps = kh * kw * cin
    # (O, I, KH, KW) -> (KH, KW, I, O) -> (KH*KW*I, O)
    w_flat = jnp.transpose(weight_oihw, (2, 3, 1, 0)).reshape(ktaps, cout)
    w_splat = jnp.zeros((ktaps, COUT_PAD, hw_out), weight_oihw.dtype)
    w_splat = w_splat.at[:, :cout, :].set(w_flat[:, :, None])
    b_splat = jnp.zeros((COUT_PAD, hw_out), bias.dtype)
    b_splat = b_splat.at[:cout, :].set(bias[:, None])
    return w_splat, b_splat


def conv2d_kernel(x_ref, w_ref, b_ref, o_ref, xrep_ref, *, width, nb):
    """One batch-block of images per grid step.

    x_ref:    (Nb, CIN, HW)                   flattened images, spatial in lanes
    w_ref:    (KH*KW*CIN, COUT_PAD, HW_OUT)   lane-splatted weights (resident)
    b_ref:    (COUT_PAD, HW_OUT)              lane-splatted bias (resident)
    o_ref:    (Nb, COUT_PAD, HW_OUT)          out[co, oh*W + ow]
    xrep_ref: (Nb, CIN*COUT_PAD, HWP)         scratch: each channel row
              replicated across COUT_PAD sublanes.  Lanes [HW, HWP) are
              don't-care: they only feed output columns the wrapper discards.
    """
    hw = x_ref.shape[-1]
    hw_out = o_ref.shape[-1]

    # One sublane splat per (image, channel): 3 per image instead of 27
    # per-tap broadcasts, so the hot loop below is loads + VPU FMAs only.
    for i in range(nb):
        for c in range(CIN):
            row = x_ref[i, pl.ds(c, 1), :]                             # (1, HW)
            xrep_ref[i, pl.ds(c * COUT_PAD, COUT_PAD), pl.ds(0, hw)] = (
                jnp.broadcast_to(row, (COUT_PAD, hw)))

    bias_tile = b_ref[...].astype(jnp.float32)                         # (COUT_PAD, HW_OUT)

    for i in range(nb):
        acc = bias_tile                                                # bias folded into init
        for kh in range(KH):
            for kw in range(KW):
                s = kh * width + kw                                    # static lane shift
                # One lane-shifted window load per tap for ALL channels.
                win = xrep_ref[i, :, pl.ds(s, hw_out)]                 # (CIN*COUT_PAD, HW_OUT)
                for c in range(CIN):
                    k = (kh * KW + kw) * CIN + c
                    # Sublane slice at a multiple of 8: pure vreg selection.
                    xb = win[c * COUT_PAD:(c + 1) * COUT_PAD, :]       # (COUT_PAD, HW_OUT)
                    # Pre-splatted weight vreg * replicated input: VPU FMA in f32.
                    acc = acc + w_ref[k] * xb
        o_ref[i] = acc.astype(o_ref.dtype)


def conv2d_pallas_nchw(x_nchw, w_splat, b_splat):
    """PyTorch-semantics Conv2d(3->6, k=3, s=1, p=0) forward.

    x_nchw: (N, CIN, H, W); w_splat/b_splat from pack_conv_params (packed once).
    Returns (N, COUT, OH, OW).
    """
    N, cin, H, W = x_nchw.shape
    assert cin == CIN
    OH = (H + 2 * PAD - KH) // STRIDE + 1
    OW = (W + 2 * PAD - KW) // STRIDE + 1

    hw = H * W
    hw_out = _round_up(hw, 128)                  # lane-dense output slab width
    max_shift = (KH - 1) * W + (KW - 1)
    hwp = _round_up(hw_out + max_shift, 128)     # scratch lane count for shifted windows
    ktaps = KH * KW * CIN
    assert w_splat.shape == (ktaps, COUT_PAD, hw_out), w_splat.shape
    assert b_splat.shape == (COUT_PAD, hw_out), b_splat.shape

    # Correctness contract with the in-kernel window math: every output column
    # the final slice KEEPS (oh < OH, ow < OW) reads only real input lanes
    # (< hw).  The uninitialized scratch tail [hw, hwp) and the row-wrapped
    # columns only feed output positions that [:COUT, :OH, :OW] discards.
    assert (OH - 1) * W + (OW - 1) + max_shift < hw

    steps = _grid_steps_for_batch(N)
    nb = N // steps                              # images per grid step

    # No HBM pad/copy in the wrapper: reshape to (N, CIN, H*W) is metadata-only.
    x_flat = x_nchw.reshape(N, CIN, hw)

    kernel = functools.partial(conv2d_kernel, width=W, nb=nb)

    # Per-step VMEM: x ~6 KiB + out ~16 KiB (double-buffered) + weights 216 KiB
    # + bias 8 KiB + scratch ~73 KiB -- far below the scoped default on every
    # generation (physical: 128 MiB v5e/v6e, 64 MiB v7x); only revisit this
    # budget if Nb or H*W are scaled up substantially.
    out_slab = pl.pallas_call(
        kernel,
        out_shape=jax.ShapeDtypeStruct((N, COUT_PAD, hw_out), x_nchw.dtype),
        grid_spec=pltpu.PrefetchScalarGridSpec(
            num_scalar_prefetch=0,
            grid=(steps,),
            in_specs=[
                pl.BlockSpec((nb, CIN, hw), lambda n: (n, 0, 0)),
                # Constant index_maps -> weights/bias stay resident in VMEM
                # across grid steps (no re-DMA).
                pl.BlockSpec((ktaps, COUT_PAD, hw_out), lambda n: (0, 0, 0)),
                pl.BlockSpec((COUT_PAD, hw_out), lambda n: (0, 0)),
            ],
            out_specs=pl.BlockSpec((nb, COUT_PAD, hw_out), lambda n: (n, 0, 0)),
            scratch_shapes=[pltpu.VMEM((nb, CIN * COUT_PAD, hwp), x_nchw.dtype)],
        ),
        compiler_params=pltpu.CompilerParams(
            dimension_semantics=("parallel",)),
    )(x_flat, w_splat, b_splat)

    # slab[n, co, oh*W + ow] -> NCHW; drops padded channels & wrapped columns.
    # (If this fed another Pallas layer, keep the lane-dense slab instead.)
    out = out_slab[:, :COUT, :hw].reshape(N, COUT, H, W)[:, :, :OH, :OW]
    return out


if __name__ == "__main__":
    key = jax.random.PRNGKey(0)
    kx, kw_, kb = jax.random.split(key, 3)

    # Small shapes consistent with the module: batch=2, Cin=3, 16x16 spatial.
    N, H, W = 2, 16, 16
    x = jax.random.normal(kx, (N, CIN, H, W), dtype=jnp.float32)

    # Deterministic parameter init (matches PyTorch Conv2d's uniform bound shape-wise).
    fan_in = CIN * KH * KW
    bound = 1.0 / (fan_in ** 0.5)
    weight = jax.random.uniform(kw_, (COUT, CIN, KH, KW),
                                minval=-bound, maxval=bound, dtype=jnp.float32)
    bias = jax.random.uniform(kb, (COUT,),
                              minval=-bound, maxval=bound, dtype=jnp.float32)

    # One-time parameter packing (kept off the per-forward path).
    w_splat, b_splat = jax.block_until_ready(
        pack_conv_params(weight, bias, (H, W)))

    conv = jax.jit(conv2d_pallas_nchw)
    out = jax.block_until_ready(conv(x, w_splat, b_splat))

    # Sanity check against XLA's conv (reference), same NCHW/OIHW convention.
    ref = jax.lax.conv_general_dilated(
        x, weight, window_strides=(1, 1), padding="VALID",
        dimension_numbers=("NCHW", "OIHW", "NCHW")) + bias[None, :, None, None]
    assert out.shape == (N, COUT, H - 2, W - 2), out.shape
    assert jnp.allclose(out, ref, atol=1e-4, rtol=1e-4)

    print("KERNEL_OK")
</pallas_src>

<mosaic_0001>
module attributes {stable_mosaic.version = 11 : i64} {
  func.func @conv2d_kernel(%arg0: i32, %arg1: memref<2x3x256xf32, #tpu.memory_space<vmem>>, %arg2: memref<27x8x256xf32, #tpu.memory_space<vmem>>, %arg3: memref<8x256xf32, #tpu.memory_space<vmem>>, %arg4: memref<2x8x256xf32, #tpu.memory_space<vmem>>, %arg5: memref<2x24x384xf32, #tpu.memory_space<vmem>>) attributes {dimension_semantics = [#tpu.dimension_semantics<parallel>], iteration_bounds = array<i64: 1>, scalar_prefetch = 0 : i64, scratch_operands = 1 : i64, tpu.core_type = #tpu.core_type<tc>, window_params = [{transform_indices = @transform_0, window_bounds = array<i64: 2, 3, 256>}, {pipeline_mode = #tpu.pipeline_mode<synchronous>, transform_indices = @transform_1, window_bounds = array<i64: 27, 8, 256>}, {pipeline_mode = #tpu.pipeline_mode<synchronous>, transform_indices = @transform_2, window_bounds = array<i64: 8, 256>}, {transform_indices = @transform_3, window_bounds = array<i64: 2, 8, 256>}]} {
    %c0 = arith.constant 0 : index
    %c0_0 = arith.constant 0 : index
    %c0_1 = arith.constant 0 : index
    %0 = vector.load %arg1[%c0, %c0_0, %c0_1] : memref<2x3x256xf32, #tpu.memory_space<vmem>>, vector<1x1x256xf32>
    %1 = vector.shape_cast %0 : vector<1x1x256xf32> to vector<1x256xf32>
    %2 = vector.shape_cast %1 : vector<1x256xf32> to vector<1x256xf32>
    %3 = vector.broadcast %2 : vector<1x256xf32> to vector<8x256xf32>
    %c0_2 = arith.constant 0 : index
    %c0_3 = arith.constant 0 : index
    %c0_4 = arith.constant 0 : index
    %4 = vector.load %arg5[%c0_2, %c0_3, %c0_4] : memref<2x24x384xf32, #tpu.memory_space<vmem>>, vector<1x8x256xf32>
    %5 = vector.shape_cast %4 : vector<1x8x256xf32> to vector<8x256xf32>
    %6 = vector.shape_cast %3 : vector<8x256xf32> to vector<1x8x256xf32>
    tpu.vector_store %arg5[%c0_2, %c0_3, %c0_4], %6 {strides = array<i32>} : memref<2x24x384xf32, #tpu.memory_space<vmem>>, vector<1x8x256xf32>,
    %c0_5 = arith.constant 0 : index
    %c1 = arith.constant 1 : index
    %c0_6 = arith.constant 0 : index
    %7 = vector.load %arg1[%c0_5, %c1, %c0_6] : memref<2x3x256xf32, #tpu.memory_space<vmem>>, vector<1x1x256xf32>
    %8 = vector.shape_cast %7 : vector<1x1x256xf32> to vector<1x256xf32>
    %9 = vector.shape_cast %8 : vector<1x256xf32> to vector<1x256xf32>
    %10 = vector.broadcast %9 : vector<1x256xf32> to vector<8x256xf32>
    %c0_7 = arith.constant 0 : index
    %c8 = arith.constant 8 : index
    %c0_8 = arith.constant 0 : index
    %11 = vector.load %arg5[%c0_7, %c8, %c0_8] : memref<2x24x384xf32, #tpu.memory_space<vmem>>, vector<1x8x256xf32>
    %12 = vector.shape_cast %11 : vector<1x8x256xf32> to vector<8x256xf32>
    %13 = vector.shape_cast %10 : vector<8x256xf32> to vector<1x8x256xf32>
    tpu.vector_store %arg5[%c0_7, %c8, %c0_8], %13 {strides = array<i32>} : memref<2x24x384xf32, #tpu.memory_space<vmem>>, vector<1x8x256xf32>,
    %c0_9 = arith.constant 0 : index
    %c2 = arith.constant 2 : index
    %c0_10 = arith.constant 0 : index
    %14 = vector.load %arg1[%c0_9, %c2, %c0_10] : memref<2x3x256xf32, #tpu.memory_space<vmem>>, vector<1x1x256xf32>
    %15 = vector.shape_cast %14 : vector<1x1x256xf32> to vector<1x256xf32>
    %16 = vector.shape_cast %15 : vector<1x256xf32> to vector<1x256xf32>
    %17 = vector.broadcast %16 : vector<1x256xf32> to vector<8x256xf32>
    %c0_11 = arith.constant 0 : index
    %c16 = arith.constant 16 : index
    %c0_12 = arith.constant 0 : index
    %18 = vector.load %arg5[%c0_11, %c16, %c0_12] : memref<2x24x384xf32, #tpu.memory_space<vmem>>, vector<1x8x256xf32>
    %19 = vector.shape_cast %18 : vector<1x8x256xf32> to vector<8x256xf32>
    %20 = vector.shape_cast %17 : vector<8x256xf32> to vector<1x8x256xf32>
    tpu.vector_store %arg5[%c0_11, %c16, %c0_12], %20 {strides = array<i32>} : memref<2x24x384xf32, #tpu.memory_space<vmem>>, vector<1x8x256xf32>,
    %c1_13 = arith.constant 1 : index
    %c0_14 = arith.constant 0 : index
    %c0_15 = arith.constant 0 : index
    %21 = vector.load %arg1[%c1_13, %c0_14, %c0_15] : memref<2x3x256xf32, #tpu.memory_space<vmem>>, vector<1x1x256xf32>
    %22 = vector.shape_cast %21 : vector<1x1x256xf32> to vector<1x256xf32>
    %23 = vector.shape_cast %22 : vector<1x256xf32> to vector<1x256xf32>
    %24 = vector.broadcast %23 : vector<1x256xf32> to vector<8x256xf32>
    %c1_16 = arith.constant 1 : index
    %c0_17 = arith.constant 0 : index
    %c0_18 = arith.constant 0 : index
    %25 = vector.load %arg5[%c1_16, %c0_17, %c0_18] : memref<2x24x384xf32, #tpu.memory_space<vmem>>, vector<1x8x256xf32>
    %26 = vector.shape_cast %25 : vector<1x8x256xf32> to vector<8x256xf32>
    %27 = vector.shape_cast %24 : vector<8x256xf32> to vector<1x8x256xf32>
    tpu.vector_store %arg5[%c1_16, %c0_17, %c0_18], %27 {strides = array<i32>} : memref<2x24x384xf32, #tpu.memory_space<vmem>>, vector<1x8x256xf32>,
    %c1_19 = arith.constant 1 : index
    %c1_20 = arith.constant 1 : index
    %c0_21 = arith.constant 0 : index
    %28 = vector.load %arg1[%c1_19, %c1_20, %c0_21] : memref<2x3x256xf32, #tpu.memory_space<vmem>>, vector<1x1x256xf32>
    %29 = vector.shape_cast %28 : vector<1x1x256xf32> to vector<1x256xf32>
    %30 = vector.shape_cast %29 : vector<1x256xf32> to vector<1x256xf32>
    %31 = vector.broadcast %30 : vector<1x256xf32> to vector<8x256xf32>
    %c1_22 = arith.constant 1 : index
    %c8_23 = arith.constant 8 : index
    %c0_24 = arith.constant 0 : index
    %32 = vector.load %arg5[%c1_22, %c8_23, %c0_24] : memref<2x24x384xf32, #tpu.memory_space<vmem>>, vector<1x8x256xf32>
    %33 = vector.shape_cast %32 : vector<1x8x256xf32> to vector<8x256xf32>
    %34 = vector.shape_cast %31 : vector<8x256xf32> to vector<1x8x256xf32>
    tpu.vector_store %arg5[%c1_22, %c8_23, %c0_24], %34 {strides = array<i32>} : memref<2x24x384xf32, #tpu.memory_space<vmem>>, vector<1x8x256xf32>,
    %c1_25 = arith.constant 1 : index
    %c2_26 = arith.constant 2 : index
    %c0_27 = arith.constant 0 : index
    %35 = vector.load %arg1[%c1_25, %c2_26, %c0_27] : memref<2x3x256xf32, #tpu.memory_space<vmem>>, vector<1x1x256xf32>
    %36 = vector.shape_cast %35 : vector<1x1x256xf32> to vector<1x256xf32>
    %37 = vector.shape_cast %36 : vector<1x256xf32> to vector<1x256xf32>
    %38 = vector.broadcast %37 : vector<1x256xf32> to vector<8x256xf32>
    %c1_28 = arith.constant 1 : index
    %c16_29 = arith.constant 16 : index
    %c0_30 = arith.constant 0 : index
    %39 = vector.load %arg5[%c1_28, %c16_29, %c0_30] : memref<2x24x384xf32, #tpu.memory_space<vmem>>, vector<1x8x256xf32>
    %40 = vector.shape_cast %39 : vector<1x8x256xf32> to vector<8x256xf32>
    %41 = vector.shape_cast %38 : vector<8x256xf32> to vector<1x8x256xf32>
    tpu.vector_store %arg5[%c1_28, %c16_29, %c0_30], %41 {strides = array<i32>} : memref<2x24x384xf32, #tpu.memory_space<vmem>>, vector<1x8x256xf32>,
    %c0_31 = arith.constant 0 : index
    %c0_32 = arith.constant 0 : index
    %42 = vector.load %arg3[%c0_31, %c0_32] : memref<8x256xf32, #tpu.memory_space<vmem>>, vector<8x256xf32>
    %c0_33 = arith.constant 0 : index
    %c0_34 = arith.constant 0 : index
    %c0_35 = arith.constant 0 : index
    %43 = vector.load %arg5[%c0_33, %c0_34, %c0_35] : memref<2x24x384xf32, #tpu.memory_space<vmem>>, vector<1x24x256xf32>
    %44 = vector.shape_cast %43 : vector<1x24x256xf32> to vector<24x256xf32>
    %45 = vector.extract_strided_slice %44 {offsets = [0, 0], sizes = [8, 256], strides = [1, 1]} : vector<24x256xf32> to vector<8x256xf32>
    %c0_36 = arith.constant 0 : index
    %c0_37 = arith.constant 0 : index
    %c0_38 = arith.constant 0 : index
    %46 = vector.load %arg2[%c0_36, %c0_37, %c0_38] : memref<27x8x256xf32, #tpu.memory_space<vmem>>, vector<1x8x256xf32>
    %47 = vector.shape_cast %46 : vector<1x8x256xf32> to vector<8x256xf32>
    %48 = arith.mulf %47, %45 : vector<8x256xf32>
    %49 = arith.addf %42, %48 : vector<8x256xf32>
    %50 = vector.extract_strided_slice %44 {offsets = [8, 0], sizes = [8, 256], strides = [1, 1]} : vector<24x256xf32> to vector<8x256xf32>
    %c1_39 = arith.constant 1 : index
    %c0_40 = arith.constant 0 : index
    %c0_41 = arith.constant 0 : index
    %51 = vector.load %arg2[%c1_39, %c0_40, %c0_41] : memref<27x8x256xf32, #tpu.memory_space<vmem>>, vector<1x8x256xf32>
    %52 = vector.shape_cast %51 : vector<1x8x256xf32> to vector<8x256xf32>
    %53 = arith.mulf %52, %50 : vector<8x256xf32>
    %54 = arith.addf %49, %53 : vector<8x256xf32>
    %55 = vector.extract_strided_slice %44 {offsets = [16, 0], sizes = [8, 256], strides = [1, 1]} : vector<24x256xf32> to vector<8x256xf32>
    %c2_42 = arith.constant 2 : index
    %c0_43 = arith.constant 0 : index
    %c0_44 = arith.constant 0 : index
    %56 = vector.load %arg2[%c2_42, %c0_43, %c0_44] : memref<27x8x256xf32, #tpu.memory_space<vmem>>, vector<1x8x256xf32>
    %57 = vector.shape_cast %56 : vector<1x8x256xf32> to vector<8x256xf32>
    %58 = arith.mulf %57, %55 : vector<8x256xf32>
    %59 = arith.addf %54, %58 : vector<8x256xf32>
    %c0_45 = arith.constant 0 : index
    %c0_46 = arith.constant 0 : index
    %c1_47 = arith.constant 1 : index
    %60 = vector.load %arg5[%c0_45, %c0_46, %c1_47] : memref<2x24x384xf32, #tpu.memory_space<vmem>>, vector<1x24x256xf32>
    %61 = vector.shape_cast %60 : vector<1x24x256xf32> to vector<24x256xf32>
    %62 = vector.extract_strided_slice %61 {offsets = [0, 0], sizes = [8, 256], strides = [1, 1]} : vector<24x256xf32> to vector<8x256xf32>
    %c3 = arith.constant 3 : index
    %c0_48 = arith.constant 0 : index
    %c0_49 = arith.constant 0 : index
    %63 = vector.load %arg2[%c3, %c0_48, %c0_49] : memref<27x8x256xf32, #tpu.memory_space<vmem>>, vector<1x8x256xf32>
    %64 = vector.shape_cast %63 : vector<1x8x256xf32> to vector<8x256xf32>
    %65 = arith.mulf %64, %62 : vector<8x256xf32>
    %66 = arith.addf %59, %65 : vector<8x256xf32>
    %67 = vector.extract_strided_slice %61 {offsets = [8, 0], sizes = [8, 256], strides = [1, 1]} : vector<24x256xf32> to vector<8x256xf32>
    %c4 = arith.constant 4 : index
    %c0_50 = arith.constant 0 : index
    %c0_51 = arith.constant 0 : index
    %68 = vector.load %arg2[%c4, %c0_50, %c0_51] : memref<27x8x256xf32, #tpu.memory_space<vmem>>, vector<1x8x256xf32>
    %69 = vector.shape_cast %68 : vector<1x8x256xf32> to vector<8x256xf32>
    %70 = arith.mulf %69, %67 : vector<8x256xf32>
    %71 = arith.addf %66, %70 : vector<8x256xf32>
    %72 = vector.extract_strided_slice %61 {offsets = [16, 0], sizes = [8, 256], strides = [1, 1]} : vector<24x256xf32> to vector<8x256xf32>
    %c5 = arith.constant 5 : index
    %c0_52 = arith.constant 0 : index
    %c0_53 = arith.constant 0 : index
    %73 = vector.load %arg2[%c5, %c0_52, %c0_53] : memref<27x8x256xf32, #tpu.memory_space<vmem>>, vector<1x8x256xf32>
    %74 = vector.shape_cast %73 : vector<1x8x256xf32> to vector<8x256xf32>
    %75 = arith.mulf %74, %72 : vector<8x256xf32>
    %76 = arith.addf %71, %75 : vector<8x256xf32>
    %c0_54 = arith.constant 0 : index
    %c0_55 = arith.constant 0 : index
    %c2_56 = arith.constant 2 : index
    %77 = vector.load %arg5[%c0_54, %c0_55, %c2_56] : memref<2x24x384xf32, #tpu.memory_space<vmem>>, vector<1x24x256xf32>
    %78 = vector.shape_cast %77 : vector<1x24x256xf32> to vector<24x256xf32>
    %79 = vector.extract_strided_slice %78 {offsets = [0, 0], sizes = [8, 256], strides = [1, 1]} : vector<24x256xf32> to vector<8x256xf32>
    %c6 = arith.constant 6 : index
    %c0_57 = arith.constant 0 : index
    %c0_58 = arith.constant 0 : index
    %80 = vector.load %arg2[%c6, %c0_57, %c0_58] : memref<27x8x256xf32, #tpu.memory_space<vmem>>, vector<1x8x256xf32>
    %81 = vector.shape_cast %80 : vector<1x8x256xf32> to vector<8x256xf32>
    %82 = arith.mulf %81, %79 : vector<8x256xf32>
    %83 = arith.addf %76, %82 : vector<8x256xf32>
    %84 = vector.extract_strided_slice %78 {offsets = [8, 0], sizes = [8, 256], strides = [1, 1]} : vector<24x256xf32> to vector<8x256xf32>
    %c7 = arith.constant 7 : index
    %c0_59 = arith.constant 0 : index
    %c0_60 = arith.constant 0 : index
    %85 = vector.load %arg2[%c7, %c0_59, %c0_60] : memref<27x8x256xf32, #tpu.memory_space<vmem>>, vector<1x8x256xf32>
    %86 = vector.shape_cast %85 : vector<1x8x256xf32> to vector<8x256xf32>
    %87 = arith.mulf %86, %84 : vector<8x256xf32>
    %88 = arith.addf %83, %87 : vector<8x256xf32>
    %89 = vector.extract_strided_slice %78 {offsets = [16, 0], sizes = [8, 256], strides = [1, 1]} : vector<24x256xf32> to vector<8x256xf32>
    %c8_61 = arith.constant 8 : index
    %c0_62 = arith.constant 0 : index
    %c0_63 = arith.constant 0 : index
    %90 = vector.load %arg2[%c8_61, %c0_62, %c0_63] : memref<27x8x256xf32, #tpu.memory_space<vmem>>, vector<1x8x256xf32>
    %91 = vector.shape_cast %90 : vector<1x8x256xf32> to vector<8x256xf32>
    %92 = arith.mulf %91, %89 : vector<8x256xf32>
    %93 = arith.addf %88, %92 : vector<8x256xf32>
    %c0_64 = arith.constant 0 : index
    %c0_65 = arith.constant 0 : index
    %c16_66 = arith.constant 16 : index
    %94 = vector.load %arg5[%c0_64, %c0_65, %c16_66] : memref<2x24x384xf32, #tpu.memory_space<vmem>>, vector<1x24x256xf32>
    %95 = vector.shape_cast %94 : vector<1x24x256xf32> to vector<24x256xf32>
    %96 = vector.extract_strided_slice %95 {offsets = [0, 0], sizes = [8, 256], strides = [1, 1]} : vector<24x256xf32> to vector<8x256xf32>
    %c9 = arith.constant 9 : index
    %c0_67 = arith.constant 0 : index
    %c0_68 = arith.constant 0 : index
    %97 = vector.load %arg2[%c9, %c0_67, %c0_68] : memref<27x8x256xf32, #tpu.memory_space<vmem>>, vector<1x8x256xf32>
    %98 = vector.shape_cast %97 : vector<1x8x256xf32> to vector<8x256xf32>
    %99 = arith.mulf %98, %96 : vector<8x256xf32>
    %100 = arith.addf %93, %99 : vector<8x256xf32>
    %101 = vector.extract_strided_slice %95 {offsets = [8, 0], sizes = [8, 256], strides = [1, 1]} : vector<24x256xf32> to vector<8x256xf32>
    %c10 = arith.constant 10 : index
    %c0_69 = arith.constant 0 : index
    %c0_70 = arith.constant 0 : index
    %102 = vector.load %arg2[%c10, %c0_69, %c0_70] : memref<27x8x256xf32, #tpu.memory_space<vmem>>, vector<1x8x256xf32>
    %103 = vector.shape_cast %102 : vector<1x8x256xf32> to vector<8x256xf32>
    %104 = arith.mulf %103, %101 : vector<8x256xf32>
    %105 = arith.addf %100, %104 : vector<8x256xf32>
    %106 = vector.extract_strided_slice %95 {offsets = [16, 0], sizes = [8, 256], strides = [1, 1]} : vector<24x256xf32> to vector<8x256xf32>
    %c11 = arith.constant 11 : index
    %c0_71 = arith.constant 0 : index
    %c0_72 = arith.constant 0 : index
    %107 = vector.load %arg2[%c11, %c0_71, %c0_72] : memref<27x8x256xf32, #tpu.memory_space<vmem>>, vector<1x8x256xf32>
    %108 = vector.shape_cast %107 : vector<1x8x256xf32> to vector<8x256xf32>
    %109 = arith.mulf %108, %106 : vector<8x256xf32>
    %110 = arith.addf %105, %109 : vector<8x256xf32>
    %c0_73 = arith.constant 0 : index
    %c0_74 = arith.constant 0 : index
    %c17 = arith.constant 17 : index
    %111 = vector.load %arg5[%c0_73, %c0_74, %c17] : memref<2x24x384xf32, #tpu.memory_space<vmem>>, vector<1x24x256xf32>
    %112 = vector.shape_cast %111 : vector<1x24x256xf32> to vector<24x256xf32>
    %113 = vector.extract_strided_slice %112 {offsets = [0, 0], sizes = [8, 256], strides = [1, 1]} : vector<24x256xf32> to vector<8x256xf32>
    %c12 = arith.constant 12 : index
    %c0_75 = arith.constant 0 : index
    %c0_76 = arith.constant 0 : index
    %114 = vector.load %arg2[%c12, %c0_75, %c0_76] : memref<27x8x256xf32, #tpu.memory_space<vmem>>, vector<1x8x256xf32>
    %115 = vector.shape_cast %114 : vector<1x8x256xf32> to vector<8x256xf32>
    %116 = arith.mulf %115, %113 : vector<8x256xf32>
    %117 = arith.addf %110, %116 : vector<8x256xf32>
    %118 = vector.extract_strided_slice %112 {offsets = [8, 0], sizes = [8, 256], strides = [1, 1]} : vector<24x256xf32> to vector<8x256xf32>
    %c13 = arith.constant 13 : index
    %c0_77 = arith.constant 0 : index
    %c0_78 = arith.constant 0 : index
    %119 = vector.load %arg2[%c13, %c0_77, %c0_78] : memref<27x8x256xf32, #tpu.memory_space<vmem>>, vector<1x8x256xf32>
    %120 = vector.shape_cast %119 : vector<1x8x256xf32> to vector<8x256xf32>
    %121 = arith.mulf %120, %118 : vector<8x256xf32>
    %122 = arith.addf %117, %121 : vector<8x256xf32>
    %123 = vector.extract_strided_slice %112 {offsets = [16, 0], sizes = [8, 256], strides = [1, 1]} : vector<24x256xf32> to vector<8x256xf32>
    %c14 = arith.constant 14 : index
    %c0_79 = arith.constant 0 : index
    %c0_80 = arith.constant 0 : index
    %124 = vector.load %arg2[%c14, %c0_79, %c0_80] : memref<27x8x256xf32, #tpu.memory_space<vmem>>, vector<1x8x256xf32>
    %125 = vector.shape_cast %124 : vector<1x8x256xf32> to vector<8x256xf32>
    %126 = arith.mulf %125, %123 : vector<8x256xf32>
    %127 = arith.addf %122, %126 : vector<8x256xf32>
    %c0_81 = arith.constant 0 : index
    %c0_82 = arith.constant 0 : index
    %c18 = arith.constant 18 : index
    %128 = vector.load %arg5[%c0_81, %c0_82, %c18] : memref<2x24x384xf32, #tpu.memory_space<vmem>>, vector<1x24x256xf32>
    %129 = vector.shape_cast %128 : vector<1x24x256xf32> to vector<24x256xf32>
    %130 = vector.extract_strided_slice %129 {offsets = [0, 0], sizes = [8, 256], strides = [1, 1]} : vector<24x256xf32> to vector<8x256xf32>
    %c15 = arith.constant 15 : index
    %c0_83 = arith.constant 0 : index
    %c0_84 = arith.constant 0 : index
    %131 = vector.load %arg2[%c15, %c0_83, %c0_84] : memref<27x8x256xf32, #tpu.memory_space<vmem>>, vector<1x8x256xf32>
    %132 = vector.shape_cast %131 : vector<1x8x256xf32> to vector<8x256xf32>
    %133 = arith.mulf %132, %130 : vector<8x256xf32>
    %134 = arith.addf %127, %133 : vector<8x256xf32>
    %135 = vector.extract_strided_slice %129 {offsets = [8, 0], sizes = [8, 256], strides = [1, 1]} : vector<24x256xf32> to vector<8x256xf32>
    %c16_85 = arith.constant 16 : index
    %c0_86 = arith.constant 0 : index
    %c0_87 = arith.constant 0 : index
    %136 = vector.load %arg2[%c16_85, %c0_86, %c0_87] : memref<27x8x256xf32, #tpu.memory_space<vmem>>, vector<1x8x256xf32>
    %137 = vector.shape_cast %136 : vector<1x8x256xf32> to vector<8x256xf32>
    %138 = arith.mulf %137, %135 : vector<8x256xf32>
    %139 = arith.addf %134, %138 : vector<8x256xf32>
    %140 = vector.extract_strided_slice %129 {offsets = [16, 0], sizes = [8, 256], strides = [1, 1]} : vector<24x256xf32> to vector<8x256xf32>
    %c17_88 = arith.constant 17 : index
    %c0_89 = arith.constant 0 : index
    %c0_90 = arith.constant 0 : index
    %141 = vector.load %arg2[%c17_88, %c0_89, %c0_90] : memref<27x8x256xf32, #tpu.memory_space<vmem>>, vector<1x8x256xf32>
    %142 = vector.shape_cast %141 : vector<1x8x256xf32> to vector<8x256xf32>
    %143 = arith.mulf %142, %140 : vector<8x256xf32>
    %144 = arith.addf %139, %143 : vector<8x256xf32>
    %c0_91 = arith.constant 0 : index
    %c0_92 = arith.constant 0 : index
    %c32 = arith.constant 32 : index
    %145 = vector.load %arg5[%c0_91, %c0_92, %c32] : memref<2x24x384xf32, #tpu.memory_space<vmem>>, vector<1x24x256xf32>
    %146 = vector.shape_cast %145 : vector<1x24x256xf32> to vector<24x256xf32>
    %147 = vector.extract_strided_slice %146 {offsets = [0, 0], sizes = [8, 256], strides = [1, 1]} : vector<24x256xf32> to vector<8x256xf32>
    %c18_93 = arith.constant 18 : index
    %c0_94 = arith.constant 0 : index
    %c0_95 = arith.constant 0 : index
    %148 = vector.load %arg2[%c18_93, %c0_94, %c0_95] : memref<27x8x256xf32, #tpu.memory_space<vmem>>, vector<1x8x256xf32>
    %149 = vector.shape_cast %148 : vector<1x8x256xf32> to vector<8x256xf32>
    %150 = arith.mulf %149, %147 : vector<8x256xf32>
    %151 = arith.addf %144, %150 : vector<8x256xf32>
    %152 = vector.extract_strided_slice %146 {offsets = [8, 0], sizes = [8, 256], strides = [1, 1]} : vector<24x256xf32> to vector<8x256xf32>
    %c19 = arith.constant 19 : index
    %c0_96 = arith.constant 0 : index
    %c0_97 = arith.constant 0 : index
    %153 = vector.load %arg2[%c19, %c0_96, %c0_97] : memref<27x8x256xf32, #tpu.memory_space<vmem>>, vector<1x8x256xf32>
    %154 = vector.shape_cast %153 : vector<1x8x256xf32> to vector<8x256xf32>
    %155 = arith.mulf %154, %152 : vector<8x256xf32>
    %156 = arith.addf %151, %155 : vector<8x256xf32>
    %157 = vector.extract_strided_slice %146 {offsets = [16, 0], sizes = [8, 256], strides = [1, 1]} : vector<24x256xf32> to vector<8x256xf32>
    %c20 = arith.constant 20 : index
    %c0_98 = arith.constant 0 : index
    %c0_99 = arith.constant 0 : index
    %158 = vector.load %arg2[%c20, %c0_98, %c0_99] : memref<27x8x256xf32, #tpu.memory_space<vmem>>, vector<1x8x256xf32>
    %159 = vector.shape_cast %158 : vector<1x8x256xf32> to vector<8x256xf32>
    %160 = arith.mulf %159, %157 : vector<8x256xf32>
    %161 = arith.addf %156, %160 : vector<8x256xf32>
    %c0_100 = arith.constant 0 : index
    %c0_101 = arith.constant 0 : index
    %c33 = arith.constant 33 : index
    %162 = vector.load %arg5[%c0_100, %c0_101, %c33] : memref<2x24x384xf32, #tpu.memory_space<vmem>>, vector<1x24x256xf32>
    %163 = vector.shape_cast %162 : vector<1x24x256xf32> to vector<24x256xf32>
    %164 = vector.extract_strided_slice %163 {offsets = [0, 0], sizes = [8, 256], strides = [1, 1]} : vector<24x256xf32> to vector<8x256xf32>
    %c21 = arith.constant 21 : index
    %c0_102 = arith.constant 0 : index
    %c0_103 = arith.constant 0 : index
    %165 = vector.load %arg2[%c21, %c0_102, %c0_103] : memref<27x8x256xf32, #tpu.memory_space<vmem>>, vector<1x8x256xf32>
    %166 = vector.shape_cast %165 : vector<1x8x256xf32> to vector<8x256xf32>
    %167 = arith.mulf %166, %164 : vector<8x256xf32>
    %168 = arith.addf %161, %167 : vector<8x256xf32>
    %169 = vector.extract_strided_slice %163 {offsets = [8, 0], sizes = [8, 256], strides = [1, 1]} : vector<24x256xf32> to vector<8x256xf32>
    %c22 = arith.constant 22 : index
    %c0_104 = arith.constant 0 : index
    %c0_105 = arith.constant 0 : index
    %170 = vector.load %arg2[%c22, %c0_104, %c0_105] : memref<27x8x256xf32, #tpu.memory_space<vmem>>, vector<1x8x256xf32>
    %171 = vector.shape_cast %170 : vector<1x8x256xf32> to vector<8x256xf32>
    %172 = arith.mulf %171, %169 : vector<8x256xf32>
    %173 = arith.addf %168, %172 : vector<8x256xf32>
    %174 = vector.extract_strided_slice %163 {offsets = [16, 0], sizes = [8, 256], strides = [1, 1]} : vector<24x256xf32> to vector<8x256xf32>
    %c23 = arith.constant 23 : index
    %c0_106 = arith.constant 0 : index
    %c0_107 = arith.constant 0 : index
    %175 = vector.load %arg2[%c23, %c0_106, %c0_107] : memref<27x8x256xf32, #tpu.memory_space<vmem>>, vector<1x8x256xf32>
    %176 = vector.shape_cast %175 : vector<1x8x256xf32> to vector<8x256xf32>
    %177 = arith.mulf %176, %174 : vector<8x256xf32>
    %178 = arith.addf %173, %177 : vector<8x256xf32>
    %c0_108 = arith.constant 0 : index
    %c0_109 = arith.constant 0 : index
    %c34 = arith.constant 34 : index
    %179 = vector.load %arg5[%c0_108, %c0_109, %c34] : memref<2x24x384xf32, #tpu.memory_space<vmem>>, vector<1x24x256xf32>
    %180 = vector.shape_cast %179 : vector<1x24x256xf32> to vector<24x256xf32>
    %181 = vector.extract_strided_slice %180 {offsets = [0, 0], sizes = [8, 256], strides = [1, 1]} : vector<24x256xf32> to vector<8x256xf32>
    %c24 = arith.constant 24 : index
    %c0_110 = arith.constant 0 : index
    %c0_111 = arith.constant 0 : index
    %182 = vector.load %arg2[%c24, %c0_110, %c0_111] : memref<27x8x256xf32, #tpu.memory_space<vmem>>, vector<1x8x256xf32>
    %183 = vector.shape_cast %182 : vector<1x8x256xf32> to vector<8x256xf32>
    %184 = arith.mulf %183, %181 : vector<8x256xf32>
    %185 = arith.addf %178, %184 : vector<8x256xf32>
    %186 = vector.extract_strided_slice %180 {offsets = [8, 0], sizes = [8, 256], strides = [1, 1]} : vector<24x256xf32> to vector<8x256xf32>
    %c25 = arith.constant 25 : index
    %c0_112 = arith.constant 0 : index
    %c0_113 = arith.constant 0 : index
    %187 = vector.load %arg2[%c25, %c0_112, %c0_113] : memref<27x8x256xf32, #tpu.memory_space<vmem>>, vector<1x8x256xf32>
    %188 = vector.shape_cast %187 : vector<1x8x256xf32> to vector<8x256xf32>
    %189 = arith.mulf %188, %186 : vector<8x256xf32>
    %190 = arith.addf %185, %189 : vector<8x256xf32>
    %191 = vector.extract_strided_slice %180 {offsets = [16, 0], sizes = [8, 256], strides = [1, 1]} : vector<24x256xf32> to vector<8x256xf32>
    %c26 = arith.constant 26 : index
    %c0_114 = arith.constant 0 : index
    %c0_115 = arith.constant 0 : index
    %192 = vector.load %arg2[%c26, %c0_114, %c0_115] : memref<27x8x256xf32, #tpu.memory_space<vmem>>, vector<1x8x256xf32>
    %193 = vector.shape_cast %192 : vector<1x8x256xf32> to vector<8x256xf32>
    %194 = arith.mulf %193, %191 : vector<8x256xf32>
    %195 = arith.addf %190, %194 : vector<8x256xf32>
    %c0_116 = arith.constant 0 : index
    %c0_117 = arith.constant 0 : index
    %c0_118 = arith.constant 0 : index
    %196 = vector.load %arg4[%c0_116, %c0_117, %c0_118] : memref<2x8x256xf32, #tpu.memory_space<vmem>>, vector<1x8x256xf32>
    %197 = vector.shape_cast %196 : vector<1x8x256xf32> to vector<8x256xf32>
    %198 = vector.shape_cast %195 : vector<8x256xf32> to vector<1x8x256xf32>
    tpu.vector_store %arg4[%c0_116, %c0_117, %c0_118], %198 {strides = array<i32>} : memref<2x8x256xf32, #tpu.memory_space<vmem>>, vector<1x8x256xf32>,
    %c1_119 = arith.constant 1 : index
    %c0_120 = arith.constant 0 : index
    %c0_121 = arith.constant 0 : index
    %199 = vector.load %arg5[%c1_119, %c0_120, %c0_121] : memref<2x24x384xf32, #tpu.memory_space<vmem>>, vector<1x24x256xf32>
    %200 = vector.shape_cast %199 : vector<1x24x256xf32> to vector<24x256xf32>
    %201 = vector.extract_strided_slice %200 {offsets = [0, 0], sizes = [8, 256], strides = [1, 1]} : vector<24x256xf32> to vector<8x256xf32>
    %c0_122 = arith.constant 0 : index
    %c0_123 = arith.constant 0 : index
    %c0_124 = arith.constant 0 : index
    %202 = vector.load %arg2[%c0_122, %c0_123, %c0_124] : memref<27x8x256xf32, #tpu.memory_space<vmem>>, vector<1x8x256xf32>
    %203 = vector.shape_cast %202 : vector<1x8x256xf32> to vector<8x256xf32>
    %204 = arith.mulf %203, %201 : vector<8x256xf32>
    %205 = arith.addf %42, %204 : vector<8x256xf32>
    %206 = vector.extract_strided_slice %200 {offsets = [8, 0], sizes = [8, 256], strides = [1, 1]} : vector<24x256xf32> to vector<8x256xf32>
    %c1_125 = arith.constant 1 : index
    %c0_126 = arith.constant 0 : index
    %c0_127 = arith.constant 0 : index
    %207 = vector.load %arg2[%c1_125, %c0_126, %c0_127] : memref<27x8x256xf32, #tpu.memory_space<vmem>>, vector<1x8x256xf32>
    %208 = vector.shape_cast %207 : vector<1x8x256xf32> to vector<8x256xf32>
    %209 = arith.mulf %208, %206 : vector<8x256xf32>
    %210 = arith.addf %205, %209 : vector<8x256xf32>
    %211 = vector.extract_strided_slice %200 {offsets = [16, 0], sizes = [8, 256], strides = [1, 1]} : vector<24x256xf32> to vector<8x256xf32>
    %c2_128 = arith.constant 2 : index
    %c0_129 = arith.constant 0 : index
    %c0_130 = arith.constant 0 : index
    %212 = vector.load %arg2[%c2_128, %c0_129, %c0_130] : memref<27x8x256xf32, #tpu.memory_space<vmem>>, vector<1x8x256xf32>
    %213 = vector.shape_cast %212 : vector<1x8x256xf32> to vector<8x256xf32>
    %214 = arith.mulf %213, %211 : vector<8x256xf32>
    %215 = arith.addf %210, %214 : vector<8x256xf32>
    %c1_131 = arith.constant 1 : index
    %c0_132 = arith.constant 0 : index
    %c1_133 = arith.constant 1 : index
    %216 = vector.load %arg5[%c1_131, %c0_132, %c1_133] : memref<2x24x384xf32, #tpu.memory_space<vmem>>, vector<1x24x256xf32>
    %217 = vector.shape_cast %216 : vector<1x24x256xf32> to vector<24x256xf32>
    %218 = vector.extract_strided_slice %217 {offsets = [0, 0], sizes = [8, 256], strides = [1, 1]} : vector<24x256xf32> to vector<8x256xf32>
    %c3_134 = arith.constant 3 : index
    %c0_135 = arith.constant 0 : index
    %c0_136 = arith.constant 0 : index
    %219 = vector.load %arg2[%c3_134, %c0_135, %c0_136] : memref<27x8x256xf32, #tpu.memory_space<vmem>>, vector<1x8x256xf32>
    %220 = vector.shape_cast %219 : vector<1x8x256xf32> to vector<8x256xf32>
    %221 = arith.mulf %220, %218 : vector<8x256xf32>
    %222 = arith.addf %215, %221 : vector<8x256xf32>
    %223 = vector.extract_strided_slice %217 {offsets = [8, 0], sizes = [8, 256], strides = [1, 1]} : vector<24x256xf32> to vector<8x256xf32>
    %c4_137 = arith.constant 4 : index
    %c0_138 = arith.constant 0 : index
    %c0_139 = arith.constant 0 : index
    %224 = vector.load %arg2[%c4_137, %c0_138, %c0_139] : memref<27x8x256xf32, #tpu.memory_space<vmem>>, vector<1x8x256xf32>
    %225 = vector.shape_cast %224 : vector<1x8x256xf32> to vector<8x256xf32>
    %226 = arith.mulf %225, %223 : vector<8x256xf32>
    %227 = arith.addf %222, %226 : vector<8x256xf32>
    %228 = vector.extract_strided_slice %217 {offsets = [16, 0], sizes = [8, 256], strides = [1, 1]} : vector<24x256xf32> to vector<8x256xf32>
    %c5_140 = arith.constant 5 : index
    %c0_141 = arith.constant 0 : index
    %c0_142 = arith.constant 0 : index
    %229 = vector.load %arg2[%c5_140, %c0_141, %c0_142] : memref<27x8x256xf32, #tpu.memory_space<vmem>>, vector<1x8x256xf32>
    %230 = vector.shape_cast %229 : vector<1x8x256xf32> to vector<8x256xf32>
    %231 = arith.mulf %230, %228 : vector<8x256xf32>
    %232 = arith.addf %227, %231 : vector<8x256xf32>
    %c1_143 = arith.constant 1 : index
    %c0_144 = arith.constant 0 : index
    %c2_145 = arith.constant 2 : index
    %233 = vector.load %arg5[%c1_143, %c0_144, %c2_145] : memref<2x24x384xf32, #tpu.memory_space<vmem>>, vector<1x24x256xf32>
    %234 = vector.shape_cast %233 : vector<1x24x256xf32> to vector<24x256xf32>
    %235 = vector.extract_strided_slice %234 {offsets = [0, 0], sizes = [8, 256], strides = [1, 1]} : vector<24x256xf32> to vector<8x256xf32>
    %c6_146 = arith.constant 6 : index
    %c0_147 = arith.constant 0 : index
    %c0_148 = arith.constant 0 : index
    %236 = vector.load %arg2[%c6_146, %c0_147, %c0_148] : memref<27x8x256xf32, #tpu.memory_space<vmem>>, vector<1x8x256xf32>
    %237 = vector.shape_cast %236 : vector<1x8x256xf32> to vector<8x256xf32>
    %238 = arith.mulf %237, %235 : vector<8x256xf32>
    %239 = arith.addf %232, %238 : vector<8x256xf32>
    %240 = vector.extract_strided_slice %234 {offsets = [8, 0], sizes = [8, 256], strides = [1, 1]} : vector<24x256xf32> to vector<8x256xf32>
    %c7_149 = arith.constant 7 : index
    %c0_150 = arith.constant 0 : index
    %c0_151 = arith.constant 0 : index
    %241 = vector.load %arg2[%c7_149, %c0_150, %c0_151] : memref<27x8x256xf32, #tpu.memory_space<vmem>>, vector<1x8x256xf32>
    %242 = vector.shape_cast %241 : vector<1x8x256xf32> to vector<8x256xf32>
    %243 = arith.mulf %242, %240 : vector<8x256xf32>
    %244 = arith.addf %239, %243 : vector<8x256xf32>
    %245 = vector.extract_strided_slice %234 {offsets = [16, 0], sizes = [8, 256], strides = [1, 1]} : vector<24x256xf32> to vector<8x256xf32>
    %c8_152 = arith.constant 8 : index
    %c0_153 = arith.constant 0 : index
    %c0_154 = arith.constant 0 : index
    %246 = vector.load %arg2[%c8_152, %c0_153, %c0_154] : memref<27x8x256xf32, #tpu.memory_space<vmem>>, vector<1x8x256xf32>
    %247 = vector.shape_cast %246 : vector<1x8x256xf32> to vector<8x256xf32>
    %248 = arith.mulf %247, %245 : vector<8x256xf32>
    %249 = arith.addf %244, %248 : vector<8x256xf32>
    %c1_155 = arith.constant 1 : index
    %c0_156 = arith.constant 0 : index
    %c16_157 = arith.constant 16 : index
    %250 = vector.load %arg5[%c1_155, %c0_156, %c16_157] : memref<2x24x384xf32, #tpu.memory_space<vmem>>, vector<1x24x256xf32>
    %251 = vector.shape_cast %250 : vector<1x24x256xf32> to vector<24x256xf32>
    %252 = vector.extract_strided_slice %251 {offsets = [0, 0], sizes = [8, 256], strides = [1, 1]} : vector<24x256xf32> to vector<8x256xf32>
    %c9_158 = arith.constant 9 : index
    %c0_159 = arith.constant 0 : index
    %c0_160 = arith.constant 0 : index
    %253 = vector.load %arg2[%c9_158, %c0_159, %c0_160] : memref<27x8x256xf32, #tpu.memory_space<vmem>>, vector<1x8x256xf32>
    %254 = vector.shape_cast %253 : vector<1x8x256xf32> to vector<8x256xf32>
    %255 = arith.mulf %254, %252 : vector<8x256xf32>
    %256 = arith.addf %249, %255 : vector<8x256xf32>
    %257 = vector.extract_strided_slice %251 {offsets = [8, 0], sizes = [8, 256], strides = [1, 1]} : vector<24x256xf32> to vector<8x256xf32>
    %c10_161 = arith.constant 10 : index
    %c0_162 = arith.constant 0 : index
    %c0_163 = arith.constant 0 : index
    %258 = vector.load %arg2[%c10_161, %c0_162, %c0_163] : memref<27x8x256xf32, #tpu.memory_space<vmem>>, vector<1x8x256xf32>
    %259 = vector.shape_cast %258 : vector<1x8x256xf32> to vector<8x256xf32>
    %260 = arith.mulf %259, %257 : vector<8x256xf32>
    %261 = arith.addf %256, %260 : vector<8x256xf32>
    %262 = vector.extract_strided_slice %251 {offsets = [16, 0], sizes = [8, 256], strides = [1, 1]} : vector<24x256xf32> to vector<8x256xf32>
    %c11_164 = arith.constant 11 : index
    %c0_165 = arith.constant 0 : index
    %c0_166 = arith.constant 0 : index
    %263 = vector.load %arg2[%c11_164, %c0_165, %c0_166] : memref<27x8x256xf32, #tpu.memory_space<vmem>>, vector<1x8x256xf32>
    %264 = vector.shape_cast %263 : vector<1x8x256xf32> to vector<8x256xf32>
    %265 = arith.mulf %264, %262 : vector<8x256xf32>
    %266 = arith.addf %261, %265 : vector<8x256xf32>
    %c1_167 = arith.constant 1 : index
    %c0_168 = arith.constant 0 : index
    %c17_169 = arith.constant 17 : index
    %267 = vector.load %arg5[%c1_167, %c0_168, %c17_169] : memref<2x24x384xf32, #tpu.memory_space<vmem>>, vector<1x24x256xf32>
    %268 = vector.shape_cast %267 : vector<1x24x256xf32> to vector<24x256xf32>
    %269 = vector.extract_strided_slice %268 {offsets = [0, 0], sizes = [8, 256], strides = [1, 1]} : vector<24x256xf32> to vector<8x256xf32>
    %c12_170 = arith.constant 12 : index
    %c0_171 = arith.constant 0 : index
    %c0_172 = arith.constant 0 : index
    %270 = vector.load %arg2[%c12_170, %c0_171, %c0_172] : memref<27x8x256xf32, #tpu.memory_space<vmem>>, vector<1x8x256xf32>
    %271 = vector.shape_cast %270 : vector<1x8x256xf32> to vector<8x256xf32>
    %272 = arith.mulf %271, %269 : vector<8x256xf32>
    %273 = arith.addf %266, %272 : vector<8x256xf32>
    %274 = vector.extract_strided_slice %268 {offsets = [8, 0], sizes = [8, 256], strides = [1, 1]} : vector<24x256xf32> to vector<8x256xf32>
    %c13_173 = arith.constant 13 : index
    %c0_174 = arith.constant 0 : index
    %c0_175 = arith.constant 0 : index
    %275 = vector.load %arg2[%c13_173, %c0_174, %c0_175] : memref<27x8x256xf32, #tpu.memory_space<vmem>>, vector<1x8x256xf32>
    %276 = vector.shape_cast %275 : vector<1x8x256xf32> to vector<8x256xf32>
    %277 = arith.mulf %276, %274 : vector<8x256xf32>
    %278 = arith.addf %273, %277 : vector<8x256xf32>
    %279 = vector.extract_strided_slice %268 {offsets = [16, 0], sizes = [8, 256], strides = [1, 1]} : vector<24x256xf32> to vector<8x256xf32>
    %c14_176 = arith.constant 14 : index
    %c0_177 = arith.constant 0 : index
    %c0_178 = arith.constant 0 : index
    %280 = vector.load %arg2[%c14_176, %c0_177, %c0_178] : memref<27x8x256xf32, #tpu.memory_space<vmem>>, vector<1x8x256xf32>
    %281 = vector.shape_cast %280 : vector<1x8x256xf32> to vector<8x256xf32>
    %282 = arith.mulf %281, %279 : vector<8x256xf32>
    %283 = arith.addf %278, %282 : vector<8x256xf32>
    %c1_179 = arith.constant 1 : index
    %c0_180 = arith.constant 0 : index
    %c18_181 = arith.constant 18 : index
    %284 = vector.load %arg5[%c1_179, %c0_180, %c18_181] : memref<2x24x384xf32, #tpu.memory_space<vmem>>, vector<1x24x256xf32>
    %285 = vector.shape_cast %284 : vector<1x24x256xf32> to vector<24x256xf32>
    %286 = vector.extract_strided_slice %285 {offsets = [0, 0], sizes = [8, 256], strides = [1, 1]} : vector<24x256xf32> to vector<8x256xf32>
    %c15_182 = arith.constant 15 : index
    %c0_183 = arith.constant 0 : index
    %c0_184 = arith.constant 0 : index
    %287 = vector.load %arg2[%c15_182, %c0_183, %c0_184] : memref<27x8x256xf32, #tpu.memory_space<vmem>>, vector<1x8x256xf32>
    %288 = vector.shape_cast %287 : vector<1x8x256xf32> to vector<8x256xf32>
    %289 = arith.mulf %288, %286 : vector<8x256xf32>
    %290 = arith.addf %283, %289 : vector<8x256xf32>
    %291 = vector.extract_strided_slice %285 {offsets = [8, 0], sizes = [8, 256], strides = [1, 1]} : vector<24x256xf32> to vector<8x256xf32>
    %c16_185 = arith.constant 16 : index
    %c0_186 = arith.constant 0 : index
    %c0_187 = arith.constant 0 : index
    %292 = vector.load %arg2[%c16_185, %c0_186, %c0_187] : memref<27x8x256xf32, #tpu.memory_space<vmem>>, vector<1x8x256xf32>
    %293 = vector.shape_cast %292 : vector<1x8x256xf32> to vector<8x256xf32>
    %294 = arith.mulf %293, %291 : vector<8x256xf32>
    %295 = arith.addf %290, %294 : vector<8x256xf32>
    %296 = vector.extract_strided_slice %285 {offsets = [16, 0], sizes = [8, 256], strides = [1, 1]} : vector<24x256xf32> to vector<8x256xf32>
    %c17_188 = arith.constant 17 : index
    %c0_189 = arith.constant 0 : index
    %c0_190 = arith.constant 0 : index
    %297 = vector.load %arg2[%c17_188, %c0_189, %c0_190] : memref<27x8x256xf32, #tpu.memory_space<vmem>>, vector<1x8x256xf32>
    %298 = vector.shape_cast %297 : vector<1x8x256xf32> to vector<8x256xf32>
    %299 = arith.mulf %298, %296 : vector<8x256xf32>
    %300 = arith.addf %295, %299 : vector<8x256xf32>
    %c1_191 = arith.constant 1 : index
    %c0_192 = arith.constant 0 : index
    %c32_193 = arith.constant 32 : index
    %301 = vector.load %arg5[%c1_191, %c0_192, %c32_193] : memref<2x24x384xf32, #tpu.memory_space<vmem>>, vector<1x24x256xf32>
    %302 = vector.shape_cast %301 : vector<1x24x256xf32> to vector<24x256xf32>
    %303 = vector.extract_strided_slice %302 {offsets = [0, 0], sizes = [8, 256], strides = [1, 1]} : vector<24x256xf32> to vector<8x256xf32>
    %c18_194 = arith.constant 18 : index
    %c0_195 = arith.constant 0 : index
    %c0_196 = arith.constant 0 : index
    %304 = vector.load %arg2[%c18_194, %c0_195, %c0_196] : memref<27x8x256xf32, #tpu.memory_space<vmem>>, vector<1x8x256xf32>
    %305 = vector.shape_cast %304 : vector<1x8x256xf32> to vector<8x256xf32>
    %306 = arith.mulf %305, %303 : vector<8x256xf32>
    %307 = arith.addf %300, %306 : vector<8x256xf32>
    %308 = vector.extract_strided_slice %302 {offsets = [8, 0], sizes = [8, 256], strides = [1, 1]} : vector<24x256xf32> to vector<8x256xf32>
    %c19_197 = arith.constant 19 : index
    %c0_198 = arith.constant 0 : index
    %c0_199 = arith.constant 0 : index
    %309 = vector.load %arg2[%c19_197, %c0_198, %c0_199] : memref<27x8x256xf32, #tpu.memory_space<vmem>>, vector<1x8x256xf32>
    %310 = vector.shape_cast %309 : vector<1x8x256xf32> to vector<8x256xf32>
    %311 = arith.mulf %310, %308 : vector<8x256xf32>
    %312 = arith.addf %307, %311 : vector<8x256xf32>
    %313 = vector.extract_strided_slice %302 {offsets = [16, 0], sizes = [8, 256], strides = [1, 1]} : vector<24x256xf32> to vector<8x256xf32>
    %c20_200 = arith.constant 20 : index
    %c0_201 = arith.constant 0 : index
    %c0_202 = arith.constant 0 : index
    %314 = vector.load %arg2[%c20_200, %c0_201, %c0_202] : memref<27x8x256xf32, #tpu.memory_space<vmem>>, vector<1x8x256xf32>
    %315 = vector.shape_cast %314 : vector<1x8x256xf32> to vector<8x256xf32>
    %316 = arith.mulf %315, %313 : vector<8x256xf32>
    %317 = arith.addf %312, %316 : vector<8x256xf32>
    %c1_203 = arith.constant 1 : index
    %c0_204 = arith.constant 0 : index
    %c33_205 = arith.constant 33 : index
    %318 = vector.load %arg5[%c1_203, %c0_204, %c33_205] : memref<2x24x384xf32, #tpu.memory_space<vmem>>, vector<1x24x256xf32>
    %319 = vector.shape_cast %318 : vector<1x24x256xf32> to vector<24x256xf32>
    %320 = vector.extract_strided_slice %319 {offsets = [0, 0], sizes = [8, 256], strides = [1, 1]} : vector<24x256xf32> to vector<8x256xf32>
    %c21_206 = arith.constant 21 : index
    %c0_207 = arith.constant 0 : index
    %c0_208 = arith.constant 0 : index
    %321 = vector.load %arg2[%c21_206, %c0_207, %c0_208] : memref<27x8x256xf32, #tpu.memory_space<vmem>>, vector<1x8x256xf32>
    %322 = vector.shape_cast %321 : vector<1x8x256xf32> to vector<8x256xf32>
    %323 = arith.mulf %322, %320 : vector<8x256xf32>
    %324 = arith.addf %317, %323 : vector<8x256xf32>
    %325 = vector.extract_strided_slice %319 {offsets = [8, 0], sizes = [8, 256], strides = [1, 1]} : vector<24x256xf32> to vector<8x256xf32>
    %c22_209 = arith.constant 22 : index
    %c0_210 = arith.constant 0 : index
    %c0_211 = arith.constant 0 : index
    %326 = vector.load %arg2[%c22_209, %c0_210, %c0_211] : memref<27x8x256xf32, #tpu.memory_space<vmem>>, vector<1x8x256xf32>
    %327 = vector.shape_cast %326 : vector<1x8x256xf32> to vector<8x256xf32>
    %328 = arith.mulf %327, %325 : vector<8x256xf32>
    %329 = arith.addf %324, %328 : vector<8x256xf32>
    %330 = vector.extract_strided_slice %319 {offsets = [16, 0], sizes = [8, 256], strides = [1, 1]} : vector<24x256xf32> to vector<8x256xf32>
    %c23_212 = arith.constant 23 : index
    %c0_213 = arith.constant 0 : index
    %c0_214 = arith.constant 0 : index
    %331 = vector.load %arg2[%c23_212, %c0_213, %c0_214] : memref<27x8x256xf32, #tpu.memory_space<vmem>>, vector<1x8x256xf32>
    %332 = vector.shape_cast %331 : vector<1x8x256xf32> to vector<8x256xf32>
    %333 = arith.mulf %332, %330 : vector<8x256xf32>
    %334 = arith.addf %329, %333 : vector<8x256xf32>
    %c1_215 = arith.constant 1 : index
    %c0_216 = arith.constant 0 : index
    %c34_217 = arith.constant 34 : index
    %335 = vector.load %arg5[%c1_215, %c0_216, %c34_217] : memref<2x24x384xf32, #tpu.memory_space<vmem>>, vector<1x24x256xf32>
    %336 = vector.shape_cast %335 : vector<1x24x256xf32> to vector<24x256xf32>
    %337 = vector.extract_strided_slice %336 {offsets = [0, 0], sizes = [8, 256], strides = [1, 1]} : vector<24x256xf32> to vector<8x256xf32>
    %c24_218 = arith.constant 24 : index
    %c0_219 = arith.constant 0 : index
    %c0_220 = arith.constant 0 : index
    %338 = vector.load %arg2[%c24_218, %c0_219, %c0_220] : memref<27x8x256xf32, #tpu.memory_space<vmem>>, vector<1x8x256xf32>
    %339 = vector.shape_cast %338 : vector<1x8x256xf32> to vector<8x256xf32>
    %340 = arith.mulf %339, %337 : vector<8x256xf32>
    %341 = arith.addf %334, %340 : vector<8x256xf32>
    %342 = vector.extract_strided_slice %336 {offsets = [8, 0], sizes = [8, 256], strides = [1, 1]} : vector<24x256xf32> to vector<8x256xf32>
    %c25_221 = arith.constant 25 : index
    %c0_222 = arith.constant 0 : index
    %c0_223 = arith.constant 0 : index
    %343 = vector.load %arg2[%c25_221, %c0_222, %c0_223] : memref<27x8x256xf32, #tpu.memory_space<vmem>>, vector<1x8x256xf32>
    %344 = vector.shape_cast %343 : vector<1x8x256xf32> to vector<8x256xf32>
    %345 = arith.mulf %344, %342 : vector<8x256xf32>
    %346 = arith.addf %341, %345 : vector<8x256xf32>
    %347 = vector.extract_strided_slice %336 {offsets = [16, 0], sizes = [8, 256], strides = [1, 1]} : vector<24x256xf32> to vector<8x256xf32>
    %c26_224 = arith.constant 26 : index
    %c0_225 = arith.constant 0 : index
    %c0_226 = arith.constant 0 : index
    %348 = vector.load %arg2[%c26_224, %c0_225, %c0_226] : memref<27x8x256xf32, #tpu.memory_space<vmem>>, vector<1x8x256xf32>
    %349 = vector.shape_cast %348 : vector<1x8x256xf32> to vector<8x256xf32>
    %350 = arith.mulf %349, %347 : vector<8x256xf32>
    %351 = arith.addf %346, %350 : vector<8x256xf32>
    %c1_227 = arith.constant 1 : index
    %c0_228 = arith.constant 0 : index
    %c0_229 = arith.constant 0 : index
    %352 = vector.load %arg4[%c1_227, %c0_228, %c0_229] : memref<2x8x256xf32, #tpu.memory_space<vmem>>, vector<1x8x256xf32>
    %353 = vector.shape_cast %352 : vector<1x8x256xf32> to vector<8x256xf32>
    %354 = vector.shape_cast %351 : vector<8x256xf32> to vector<1x8x256xf32>
    tpu.vector_store %arg4[%c1_227, %c0_228, %c0_229], %354 {strides = array<i32>} : memref<2x8x256xf32, #tpu.memory_space<vmem>>, vector<1x8x256xf32>,
    return
  }
  func.func @transform_0(%arg0: i32) -> (i32, i32, i32) {
    %c0_i32 = arith.constant 0 : i32
    %c0_i32_0 = arith.constant 0 : i32
    %c0_i32_1 = arith.constant 0 : i32
    return %arg0, %c0_i32, %c0_i32_0 : i32, i32, i32
  }
  func.func @transform_1(%arg0: i32) -> (i32, i32, i32) {
    %c0_i32 = arith.constant 0 : i32
    %c0_i32_0 = arith.constant 0 : i32
    %c0_i32_1 = arith.constant 0 : i32
    %c0_i32_2 = arith.constant 0 : i32
    return %c0_i32, %c0_i32_0, %c0_i32_1 : i32, i32, i32
  }
  func.func @transform_2(%arg0: i32) -> (i32, i32) {
    %c0_i32 = arith.constant 0 : i32
    %c0_i32_0 = arith.constant 0 : i32
    %c0_i32_1 = arith.constant 0 : i32
    return %c0_i32, %c0_i32_0 : i32, i32
  }
  func.func @transform_3(%arg0: i32) -> (i32, i32, i32) {
    %c0_i32 = arith.constant 0 : i32
    %c0_i32_0 = arith.constant 0 : i32
    %c0_i32_1 = arith.constant 0 : i32
    return %arg0, %c0_i32, %c0_i32_0 : i32, i32, i32
  }
}

</mosaic_0001>

<bundles_post_ra>
// kernel: conv2d_pallas_nchw.1
= control target key start
LH: loop header
LB: loop body
LE: loop exit
PB: predicated region body
PF: predicated region fallthrough
CT: control target
= control target key end

     0   :  { %8 = vsyncpa [#allocation4], 0  ;;  %s1048_s12 = smov [#allocation3]   ;;  %s1983_s0 = inlined_call_operand.vmem [shape: f32[2,3,256], index: 0, kind: input, shape index: {}]   ;;  %s1984_s1 = inlined_call_operand.hbm [shape: f32[27,8,256], index: 1, kind: input, shape index: {}]   ;;  %s1985_s2 = inlined_call_operand.vmem [shape: f32[8,256], index: 2, kind: input, shape index: {}]   ;;  %s1986_s3 = inlined_call_operand.vmem [shape: f32[2,8,256], index: 3, kind: output, shape index: {}]  }
   0x1   :  { %s16_s13 = sshll.u32 %s1048_s12, 4  ;;  %s1024_s16 = scalar_lea.hbm %s1984_s1, 6912  ;;  %s17_s13 = int_to_ptr.vmem [resolvable:$true] %s16_s13 }
   0x2   :  { %p1025_p0 = scmp.ne.s32.totalorder %s1984_s1, %s1024_s16  ;;  %p1028_p1 = scmp.lt.u32.totalorder %s1024_s16, %s1984_s1 }
   0x4   :  { %p1030_p2 = pnand %p1028_p1, %p1025_p0 }
   0x6   :  { %1033 = shalt.err (!%p1030_p2)
}
   0x7   :  { %s1034_s21 = scalar_lea.vmem %s17_s13, 6912  ;;  %p1039_p4 = scmp.lt.s32.totalorder %s17_s13, %s17_s13 }
   0x8   :  { %p1035_p3 = scmp.ne.s32.totalorder %s17_s13, %s1034_s21  ;;  %p1040_p5 = scmp.lt.s32.totalorder %s1034_s21, %s1034_s21 }
   0xa   :  { %p1041_p6 = por %p1040_p5, %p1039_p4 }
   0xc   :  { %p1042_p7 = pnand %p1041_p6, %p1035_p3 }
   0xe   :  { %1045 = shalt.err (!%p1042_p7)
}
   0xf   :  { %s1049_s22 = smov 256   ;;  %s1050_s23 = smov 16  }
  0x10   :  { %22 = dma.hbm_to_vmem [thread:$0]  %s1984_s1, 6912, %s17_s13, [#allocation4], %s1049_s22, %s1049_s22, %s1050_s23  }
  0x11   :  { %1046 = dma.done.wait [#allocation4], 6912  }
  0x12   :  { %1047 = vsyncadd [#allocation4], 4294960384  ;;  %v30_v0 = vlaneseq  ;;  %v1091_v4 = vld [vmem:[#allocation2 + $0x10] sm:$0xff]  ;;  %v1093_v5 = vld [vmem:[#allocation2 + $0x40] sm:$0xff]  ;;  %s1051_s26 = smov 127   ;;  %s1052_s7 = smov 126  }
  0x13   :  { %159 = vrot.lane.b32.xlu1 %v1091_v4, %s1051_s26  ;;  %200 = vrot.lane.b32.xlu0 %v1093_v5, %s1051_s26  ;;  %v1006_v6 = vld [vmem:[%s1983_s0 + $0x1] ss:$4 sm:$0x3]  ;;  %v28_v7 = vld [vmem:[%s1983_s0] ss:$4 sm:$0x3] }
  0x14   :  { %v31_v1 = vshrl.u32 %v30_v0, 7  ;;  %v1105_v8 = vld [vmem:[#allocation2 + $0x28] sm:$0xff]  ;;  %v1007_v11 = vld [vmem:[%s1983_s0 + $0x2] ss:$4 sm:$0x3]  ;;  %s1053_s12 = smov 112  }
  0x15   :  { %v1008_v16 = vld [vmem:[%s1983_s0 + $0x8] ss:$4 sm:$0x3]  ;;  %v1009_v19 = vld [vmem:[%s1983_s0 + $0x9] ss:$4 sm:$0x3] }
  0x16   :  { %v32_v2 = vsub.s32 0, %v31_v1  ;;  %v36_v3 = vsub.s32 1, %v31_v1  ;;  %v1010_v22 = vld [vmem:[%s1983_s0 + $0xa] ss:$4 sm:$0x3]  ;;  %s1054_s0 = smov 111  }
  0x17   :  { %180 = vrot.lane.b32.xlu1 %v1105_v8, %s1051_s26  ;;  %s1055_s13 = smov 110   ;;  %s1056_s14 = smov 96   ;;  %v1319_v41 = vld [vmem:[#allocation2 + $0x58] sm:$0xff]  ;;  %v1329_v44 = vld [vmem:[#allocation2 + $0x70] sm:$0xff]  ;;  %v1347_v49 = vld [vmem:[#allocation2 + $0x88] sm:$0xff]  ;;  %vm161_vm0 = vcmask 1039360  }
  0x18   :  { %v1107_v9 = vrot.slane %v1006_v6, %v32_v2  ;;  %v1109_v10 = vrot.slane %v28_v7, %v32_v2  ;;  %v1114_v12 = vrot.slane %v28_v7, %v36_v3  ;;  %v1116_v13 = vrot.slane %v1006_v6, %v36_v3  ;;  %s1057_s15 = smov 95   ;;  %s1058_s16 = smov 94  }
  0x19   :  { %v1118_v14 = vrot.slane %v1007_v11, %v36_v3  ;;  %v1120_v15 = vrot.slane %v1007_v11, %v32_v2  ;;  %v1137_v17 = vrot.slane %v1008_v16, %v36_v3  ;;  %v1139_v18 = vrot.slane %v1008_v16, %v32_v2  ;;  %v1434_v11 = vld [vmem:[%s1985_s2 + $0x8] sm:$0xff] }
  0x1a   :  { %155 = vrot.lane.b32.xlu0 %v1109_v10, %s1051_s26  ;;  %v1148_v20 = vrot.slane %v1009_v19, %v32_v2  ;;  %v1154_v21 = vrot.slane %v1009_v19, %v36_v3  ;;  %v1163_v23 = vrot.slane %v1010_v22, %v36_v3  ;;  %v1165_v24 = vrot.slane %v1010_v22, %v32_v2  ;;  %v1436_v16 = vld [vmem:[#allocation3 + $0x18] sm:$0xff]  ;;  %v1443_v22 = vld [vmem:[%s1985_s2] sm:$0xff] }
  0x1b   :  { %176 = vrot.lane.b32.xlu1 %v1107_v9, %s1051_s26  ;;  %2021 = vst [vmem:[#allocation13_spill] sm:$0xff] %v1434_v11  ;;  %2022 = vst [vmem:[#allocation14_spill] sm:$0xff] %v1436_v16  ;;  %vm219_vm1 = vcmask 1031168   ;;  %vm271_vm2 = vcmask 916480   ;;  %vm323_vm3 = vcmask 908288   ;;  %vm375_vm4 = vcmask 900096  }
  0x1c   :  { %2023 = vst [vmem:[#allocation15_spill] sm:$0xff] %v1443_v22  ;;  %vm427_vm5 = vcmask 785408   ;;  %vm479_vm6 = vcmask 777216   ;;  %vm531_vm7 = vcmask 769024  }
  0x1e   :  { %157 = vrot.lane.b32.xlu0 %v1114_v12, %s1051_s26 }
  0x1f   :  { %198 = vrot.lane.b32.xlu1 %v1118_v14, %s1051_s26 }
  0x22   :  { %178 = vrot.lane.b32.xlu0 %v1116_v13, %s1051_s26 }
  0x23   :  { %213 = vrot.lane.b32.xlu1 %v1109_v10, %s1052_s7 }
  0x26   :  { %196 = vrot.lane.b32.xlu0 %v1120_v15, %s1051_s26 }
  0x27   :  { %217 = vrot.lane.b32.xlu1 %v1091_v4, %s1052_s7 }
  0x2a   :  { %215 = vrot.lane.b32.xlu0 %v1114_v12, %s1052_s7 }
  0x2b   :  { %233 = vrot.lane.b32.xlu1 %v1116_v13, %s1052_s7 }
  0x2e   :  { %231 = vrot.lane.b32.xlu0 %v1107_v9, %s1052_s7 }
  0x2f   :  { %248 = vrot.lane.b32.xlu1 %v1120_v15, %s1052_s7 }
  0x32   :  { %235 = vrot.lane.b32.xlu0 %v1105_v8, %s1052_s7 }
  0x33   :  { %252 = vrot.lane.b32.xlu1 %v1093_v5, %s1052_s7 }
  0x36   :  { %250 = vrot.lane.b32.xlu0 %v1118_v14, %s1052_s7 }
  0x37   :  { %267 = vrot.lane.b32.xlu1 %v1114_v12, %s1053_s12 }
  0x3a   :  { %265 = vrot.lane.b32.xlu0 %v1109_v10, %s1053_s12 }
  0x3b   :  { %283 = vrot.lane.b32.xlu1 %v1107_v9, %s1053_s12 }
  0x3e   :  { %269 = vrot.lane.b32.xlu0 %v1091_v4, %s1053_s12 }
  0x3f   :  { %287 = vrot.lane.b32.xlu1 %v1105_v8, %s1053_s12 }
  0x42   :  { %285 = vrot.lane.b32.xlu0 %v1116_v13, %s1053_s12 }
  0x43   :  { %302 = vrot.lane.b32.xlu1 %v1118_v14, %s1053_s12 }
  0x46   :  { %300 = vrot.lane.b32.xlu0 %v1120_v15, %s1053_s12 }
  0x47   :  { %317 = vrot.lane.b32.xlu1 %v1109_v10, %s1054_s0 }
  0x4a   :  { %304 = vrot.lane.b32.xlu0 %v1093_v5, %s1053_s12 }
  0x4b   :  { %321 = vrot.lane.b32.xlu1 %v1091_v4, %s1054_s0 }
  0x4e   :  { %319 = vrot.lane.b32.xlu0 %v1114_v12, %s1054_s0 }
  0x4f   :  { %337 = vrot.lane.b32.xlu1 %v1116_v13, %s1054_s0 }
  0x52   :  { %335 = vrot.lane.b32.xlu0 %v1107_v9, %s1054_s0 }
  0x53   :  { %352 = vrot.lane.b32.xlu1 %v1120_v15, %s1054_s0 }
  0x56   :  { %339 = vrot.lane.b32.xlu0 %v1105_v8, %s1054_s0 }
  0x57   :  { %356 = vrot.lane.b32.xlu1 %v1093_v5, %s1054_s0 }
  0x5a   :  { %354 = vrot.lane.b32.xlu0 %v1118_v14, %s1054_s0 }
  0x5b   :  { %371 = vrot.lane.b32.xlu1 %v1114_v12, %s1055_s13 }
  0x5e   :  { %369 = vrot.lane.b32.xlu0 %v1109_v10, %s1055_s13 }
  0x5f   :  { %387 = vrot.lane.b32.xlu1 %v1107_v9, %s1055_s13 }
  0x62   :  { %373 = vrot.lane.b32.xlu0 %v1091_v4, %s1055_s13 }
  0x63   :  { %391 = vrot.lane.b32.xlu1 %v1105_v8, %s1055_s13 }
  0x66   :  { %389 = vrot.lane.b32.xlu0 %v1116_v13, %s1055_s13 }
  0x67   :  { %406 = vrot.lane.b32.xlu1 %v1118_v14, %s1055_s13 }
  0x6a   :  { %404 = vrot.lane.b32.xlu0 %v1120_v15, %s1055_s13 }
  0x6b   :  { %421 = vrot.lane.b32.xlu1 %v1109_v10, %s1056_s14 }
  0x6e   :  { %408 = vrot.lane.b32.xlu0 %v1093_v5, %s1055_s13 }
  0x6f   :  { %425 = vrot.lane.b32.xlu1 %v1091_v4, %s1056_s14 }
  0x72   :  { %423 = vrot.lane.b32.xlu0 %v1114_v12, %s1056_s14 }
  0x73   :  { %441 = vrot.lane.b32.xlu1 %v1116_v13, %s1056_s14 }
  0x76   :  { %439 = vrot.lane.b32.xlu0 %v1107_v9, %s1056_s14 }
  0x77   :  { %456 = vrot.lane.b32.xlu1 %v1120_v15, %s1056_s14 }
  0x7a   :  { %443 = vrot.lane.b32.xlu0 %v1105_v8, %s1056_s14 }
  0x7b   :  { %460 = vrot.lane.b32.xlu1 %v1093_v5, %s1056_s14 }
  0x7e   :  { %458 = vrot.lane.b32.xlu0 %v1118_v14, %s1056_s14 }
  0x7f   :  { %475 = vrot.lane.b32.xlu1 %v1114_v12, %s1057_s15 }
  0x82   :  { %473 = vrot.lane.b32.xlu0 %v1109_v10, %s1057_s15 }
  0x83   :  { %491 = vrot.lane.b32.xlu1 %v1107_v9, %s1057_s15 }
  0x85   :  { %v1255_v25 = vpop.permute.xlu1 %159  ;;  %v1257_v26 = vpop.permute.xlu0 %200 }
  0x86   :  { %477 = vrot.lane.b32.xlu0 %v1091_v4, %s1057_s15 }
  0x87   :  { %495 = vrot.lane.b32.xlu1 %v1105_v8, %s1057_s15 }
  0x89   :  { %v1263_v27 = vpop.permute.xlu1 %180 }
  0x8a   :  { %493 = vrot.lane.b32.xlu0 %v1116_v13, %s1057_s15 }
  0x8b   :  { %510 = vrot.lane.b32.xlu1 %v1118_v14, %s1057_s15 }
  0x8c   :  { %v1265_v28 = vpop.permute.xlu0 %155 }
  0x8d   :  { %v1271_v29 = vpop.permute.xlu1 %176 }
  0x8e   :  { %508 = vrot.lane.b32.xlu0 %v1120_v15, %s1057_s15 }
  0x8f   :  { %525 = vrot.lane.b32.xlu1 %v1109_v10, %s1058_s16 }
  0x90   :  { %v1273_v30 = vpop.permute.xlu0 %157 }
  0x91   :  { %v1279_v31 = vpop.permute.xlu1 %198 }
  0x92   :  { %512 = vrot.lane.b32.xlu0 %v1093_v5, %s1057_s15 }
  0x93   :  { %529 = vrot.lane.b32.xlu1 %v1091_v4, %s1058_s16  ;;  %v1417_v4 = vld [vmem:[#allocation3 + $0x8] sm:$0xff] }
  0x94   :  { %v1281_v32 = vpop.permute.xlu0 %178  ;;  %2017 = vst [vmem:[#allocation9_spill] sm:$0xff] %v1417_v4  ;;  %v129_v6 = vmul.f32 %v1417_v4, %v1114_v12 }
  0x95   :  { %v1287_v33 = vpop.permute.xlu1 %213 }
  0x96   :  { %527 = vrot.lane.b32.xlu0 %v1114_v12, %s1058_s16  ;;  %v1445_v12 = vld [vmem:[#allocation3 + $0x10] sm:$0xff]  ;;  %v131_v4 = vadd.f32 %v129_v6, %v1434_v11  ;;  %v1477_v11 = vld [vmem:[#allocation3 + $0x38] sm:$0xff] }
  0x97   :  { %545 = vrot.lane.b32.xlu1 %v1116_v13, %s1058_s16  ;;  %2024 = vst [vmem:[#allocation16_spill] sm:$0xff] %v1445_v12 }
  0x98   :  { %v1289_v34 = vpop.permute.xlu0 %196 }
  0x99   :  { %v1295_v35 = vpop.permute.xlu1 %217 }
  0x9a   :  { %543 = vrot.lane.b32.xlu0 %v1107_v9, %s1058_s16 }
  0x9b   :  { %560 = vrot.lane.b32.xlu1 %v1120_v15, %s1058_s16 }
  0x9c   :  { %v1297_v36 = vpop.permute.xlu0 %215 }
  0x9d   :  { %v1303_v37 = vpop.permute.xlu1 %233 }
  0x9e   :  { %547 = vrot.lane.b32.xlu0 %v1105_v8, %s1058_s16 }
  0x9f   :  { %564 = vrot.lane.b32.xlu1 %v1093_v5, %s1058_s16  ;;  %v1419_v5 = vld [vmem:[#allocation3] sm:$0xff] }
  0xa0   :  { %v1305_v38 = vpop.permute.xlu0 %231  ;;  %2018 = vst [vmem:[#allocation10_spill] sm:$0xff] %v1419_v5  ;;  %v128_v19 = vmul.f32 %v1419_v5, %v1109_v10  ;;  %v135_v5 = vmul.f32 %v1445_v12, %v1107_v9 }
  0xa1   :  { %v1311_v39 = vpop.permute.xlu1 %248 }
  0xa2   :  { %562 = vrot.lane.b32.xlu0 %v1118_v14, %s1058_s16 }
  0xa3   :  { %610 = vrot.lane.b32.xlu1 %v1137_v17, %s1051_s26 }
  0xa4   :  { %v1313_v40 = vpop.permute.xlu0 %235 }
  0xa5   :  { %v1321_v42 = vpop.permute.xlu1 %252 }
  0xa6   :  { %608 = vrot.lane.b32.xlu0 %v1139_v18, %s1051_s26 }
  0xa7   :  { %627 = vrot.lane.b32.xlu1 %v1148_v20, %s1051_s26 }
  0xa8   :  { %v1323_v43 = vpop.permute.xlu0 %250 }
  0xa9   :  { %v1331_v45 = vpop.permute.xlu1 %267 }
  0xaa   :  { %612 = vrot.lane.b32.xlu0 %v1319_v41, %s1051_s26 }
  0xab   :  { %631 = vrot.lane.b32.xlu1 %v1329_v44, %s1051_s26 }
  0xac   :  { %v1333_v46 = vpop.permute.xlu0 %265 }
  0xad   :  { %v1339_v47 = vpop.permute.xlu1 %283 }
  0xae   :  { %629 = vrot.lane.b32.xlu0 %v1154_v21, %s1051_s26 }
  0xaf   :  { %648 = vrot.lane.b32.xlu1 %v1163_v23, %s1051_s26 }
  0xb0   :  { %v1341_v48 = vpop.permute.xlu0 %269 }
  0xb1   :  { %v1349_v50 = vpop.permute.xlu1 %287 }
  0xb2   :  { %646 = vrot.lane.b32.xlu0 %v1165_v24, %s1051_s26 }
  0xb3   :  { %662 = vrot.lane.b32.xlu1 %v1139_v18, %s1052_s7 }
  0xb4   :  { %v1351_v51 = vpop.permute.xlu0 %285 }
  0xb5   :  { %v1357_v52 = vpop.permute.xlu1 %302 }
  0xb6   :  { %650 = vrot.lane.b32.xlu0 %v1347_v49, %s1051_s26 }
  0xb7   :  { %666 = vrot.lane.b32.xlu1 %v1319_v41, %s1052_s7 }
  0xb8   :  { %v1359_v53 = vpop.permute.xlu0 %300 }
  0xb9   :  { %v1365_v54 = vpop.permute.xlu1 %317 }
  0xba   :  { %664 = vrot.lane.b32.xlu0 %v1137_v17, %s1052_s7 }
  0xbb   :  { %680 = vrot.lane.b32.xlu1 %v1154_v21, %s1052_s7 }
  0xbc   :  { %v1367_v55 = vpop.permute.xlu0 %304 }
  0xbd   :  { %v1373_v56 = vpop.permute.xlu1 %321 }
  0xbe   :  { %678 = vrot.lane.b32.xlu0 %v1148_v20, %s1052_s7 }
  0xbf   :  { %694 = vrot.lane.b32.xlu1 %v1165_v24, %s1052_s7 }
  0xc0   :  { %v1375_v57 = vpop.permute.xlu0 %319 }
  0xc1   :  { %v1381_v58 = vpop.permute.xlu1 %337 }
  0xc2   :  { %682 = vrot.lane.b32.xlu0 %v1329_v44, %s1052_s7 }
  0xc3   :  { %698 = vrot.lane.b32.xlu1 %v1347_v49, %s1052_s7 }
  0xc4   :  { %v1383_v59 = vpop.permute.xlu0 %335 }
  0xc5   :  { %v1389_v60 = vpop.permute.xlu1 %352 }
  0xc6   :  { %696 = vrot.lane.b32.xlu0 %v1163_v23, %s1052_s7 }
  0xc7   :  { %712 = vrot.lane.b32.xlu1 %v1137_v17, %s1053_s12 }
  0xc8   :  { %v1391_v61 = vpop.permute.xlu0 %339 }
  0xc9   :  { %v1397_v62 = vpop.permute.xlu1 %356 }
  0xca   :  { %710 = vrot.lane.b32.xlu0 %v1139_v18, %s1053_s12 }
  0xcb   :  { %726 = vrot.lane.b32.xlu1 %v1148_v20, %s1053_s12 }
  0xcc   :  { %v1399_v63 = vpop.permute.xlu0 %354 }
  0xcd   :  { %v1405_v0 = vpop.permute.xlu1 %371 }
  0xce   :  { %714 = vrot.lane.b32.xlu0 %v1319_v41, %s1053_s12 }
  0xcf   :  { %730 = vrot.lane.b32.xlu1 %v1329_v44, %s1053_s12 }
  0xd0   :  { %v1407_v1 = vpop.permute.xlu0 %369 }
  0xd1   :  { %2014 = vst [vmem:[#allocation6_spill] sm:$0xff] %v1407_v1  ;;  %v1413_v2 = vpop.permute.xlu1 %387  ;;  %v1463_v1 = vld [vmem:[#allocation3 + $0x20] sm:$0xff] }
  0xd2   :  { %728 = vrot.lane.b32.xlu0 %v1154_v21, %s1053_s12  ;;  %2015 = vst [vmem:[#allocation7_spill] sm:$0xff] %v1413_v2  ;;  %2027 = vst [vmem:[#allocation19_spill] sm:$0xff] %v1463_v1 }
  0xd3   :  { %744 = vrot.lane.b32.xlu1 %v1163_v23, %s1053_s12 }
  0xd4   :  { %v1415_v3 = vpop.permute.xlu0 %373 }
  0xd5   :  { %2016 = vst [vmem:[#allocation8_spill] sm:$0xff] %v1415_v3  ;;  %v1427_v7 = vpop.permute.xlu1 %391  ;;  %v130_v3 = vadd.f32 %v128_v19, %v1443_v22  ;;  %v142_v19 = vmul.f32 %v1463_v1, %v1120_v15  ;;  %v163_v22 = vsel %vm161_vm0, %v1273_v30, %v1255_v25  ;;  %v1491_v15 = vld [vmem:[#allocation3 + $0x48] sm:$0xff] }
  0xd6   :  { %742 = vrot.lane.b32.xlu0 %v1165_v24, %s1053_s12  ;;  %2019 = vst [vmem:[#allocation11_spill] sm:$0xff] %v1427_v7  ;;  %v136_v7 = vmul.f32 %v1436_v16, %v1116_v13  ;;  %2029 = vst [vmem:[#allocation21_spill] sm:$0xff] %v1491_v15  ;;  %v167_v25 = vmul.f32 %v163_v22, %v1477_v11  ;;  %v202_v22 = vsel %vm161_vm0, %v1289_v34, %v1279_v31  ;;  %v1527_v34 = vld [vmem:[#allocation3 + $0x58] sm:$0xff] }
  0xd7   :  { %758 = vrot.lane.b32.xlu1 %v1139_v18, %s1054_s0  ;;  %v137_v12 = vadd.f32 %v135_v5, %v130_v3  ;;  %v183_v3 = vsel %vm161_vm0, %v1281_v32, %v1263_v27  ;;  %v1497_v5 = vld [vmem:[#allocation3 + $0x40] sm:$0xff]  ;;  %v1508_v27 = vld [vmem:[#allocation3 + $0x50] sm:$0xff] }
  0xd8   :  { %v1429_v8 = vpop.permute.xlu0 %389  ;;  %v138_v13 = vadd.f32 %v136_v7, %v131_v4  ;;  %2030 = vst [vmem:[#allocation22_spill] sm:$0xff] %v1497_v5 }
  0xd9   :  { %2020 = vst [vmem:[#allocation12_spill] sm:$0xff] %v1429_v8  ;;  %v1454_v2 = vpop.permute.xlu1 %406  ;;  %v1460_v8 = vld [vmem:[#allocation3 + $0x28] sm:$0xff] }
  0xda   :  { %746 = vrot.lane.b32.xlu0 %v1347_v49, %s1053_s12  ;;  %2026 = vst [vmem:[#allocation18_spill] sm:$0xff] %v1460_v8  ;;  %v143_v6 = vmul.f32 %v1460_v8, %v1118_v14  ;;  %v162_v14 = vsel %vm161_vm0, %v1265_v28, %v1273_v30  ;;  %v182_v28 = vsel %vm161_vm0, %v1271_v29, %v1281_v32 }
  0xdb   :  { %762 = vrot.lane.b32.xlu1 %v1319_v41, %s1054_s0  ;;  %v144_v8 = vadd.f32 %v142_v19, %v137_v12  ;;  %v186_v29 = vmul.f32 %v182_v28, %v1497_v5  ;;  %v1518_v12 = vld [vmem:[#allocation3 + $0x60] sm:$0xff]  ;;  %v206_v28 = vmul.f32 %v202_v22, %v1508_v27  ;;  %v237_v5 = vsel %vm219_vm1, %v1305_v38, %v1303_v37 }
  0xdc   :  { %v1456_v10 = vpop.permute.xlu0 %404  ;;  %v145_v4 = vadd.f32 %v143_v6, %v138_v13  ;;  %v220_v13 = vsel %vm219_vm1, %v1287_v33, %v1297_v36 }
  0xdd   :  { %2025 = vst [vmem:[#allocation17_spill] sm:$0xff] %v1456_v10  ;;  %v1471_v16 = vpop.permute.xlu1 %421  ;;  %v1482_v10 = vld [vmem:[#allocation3 + $0x30] sm:$0xff] }
  0xde   :  { %760 = vrot.lane.b32.xlu0 %v1137_v17, %s1054_s0  ;;  %2028 = vst [vmem:[#allocation20_spill] sm:$0xff] %v1471_v16  ;;  %v166_v1 = vmul.f32 %v162_v14, %v1482_v10  ;;  %v187_v16 = vmul.f32 %v183_v3, %v1491_v15  ;;  %v169_v32 = vadd.f32 %v167_v25, %v145_v4  ;;  %v1533_v4 = vld [vmem:[#allocation3 + $0x68] sm:$0xff]  ;;  %v1538_v15 = vld [vmem:[#allocation3 + $0x70] sm:$0xff] }
  0xdf   :  { %776 = vrot.lane.b32.xlu1 %v1154_v21, %s1054_s0  ;;  %v203_v14 = vsel %vm161_vm0, %v1279_v31, %v1257_v26  ;;  %v221_v25 = vsel %vm219_vm1, %v1297_v36, %v1295_v35  ;;  %v224_v31 = vmul.f32 %v220_v13, %v1518_v12  ;;  %v238_v35 = vsel %vm219_vm1, %v1303_v37, %v1313_v40 }
  0xe0   :  { %v1473_v9 = vpop.permute.xlu0 %408  ;;  %v168_v3 = vadd.f32 %v166_v1, %v144_v8  ;;  %v189_v33 = vadd.f32 %v187_v16, %v169_v32  ;;  %v1548_v1 = vld [vmem:[#allocation3 + $0x78] sm:$0xff]  ;;  %v207_v36 = vmul.f32 %v203_v14, %v1527_v34  ;;  %v225_v38 = vmul.f32 %v221_v25, %v1533_v4  ;;  %v1555_v8 = vld [vmem:[#allocation3 + $0x80] sm:$0xff]  ;;  %v1571_v25 = vld [vmem:[#allocation3 + $0x90] sm:$0xff] }
  0xe1   :  { %v1502_v30 = vpop.permute.xlu1 %425  ;;  %2031 = vst [vmem:[#allocation23_spill] sm:$0xff] %v1555_v8  ;;  %v254_v16 = vsel %vm219_vm1, %v1311_v39, %v1323_v43  ;;  %v241_v13 = vmul.f32 %v237_v5, %v1538_v15  ;;  %v255_v37 = vsel %vm219_vm1, %v1323_v43, %v1321_v42  ;;  %v242_v14 = vmul.f32 %v238_v35, %v1548_v1  ;;  %v1587_v35 = vld [vmem:[#allocation3 + $0xa0] sm:$0xff] }
  0xe2   :  { %774 = vrot.lane.b32.xlu0 %v1148_v20, %s1054_s0  ;;  %v188_v26 = vadd.f32 %v186_v29, %v168_v3  ;;  %v1565_v3 = vld [vmem:[#allocation3 + $0x88] sm:$0xff]  ;;  %v209_v40 = vadd.f32 %v207_v36, %v189_v33  ;;  %v272_v39 = vsel %vm271_vm2, %v1333_v46, %v1331_v45  ;;  %v273_v42 = vsel %vm271_vm2, %v1331_v45, %v1341_v48 }
  0xe3   :  { %790 = vrot.lane.b32.xlu1 %v1165_v24, %s1054_s0  ;;  %v259_v33 = vmul.f32 %v255_v37, %v1565_v3  ;;  %v289_v46 = vsel %vm271_vm2, %v1339_v47, %v1351_v51  ;;  %v290_v45 = vsel %vm271_vm2, %v1351_v51, %v1349_v50  ;;  %v1603_v37 = vld [vmem:[#allocation3 + $0xb0] sm:$0xff]  ;;  %v306_v47 = vsel %vm271_vm2, %v1359_v53, %v1357_v52  ;;  %v1613_v50 = vld [vmem:[#allocation3 + $0xb8] sm:$0xff] }
  0xe4   :  { %v1504_v7 = vpop.permute.xlu0 %423  ;;  %v208_v32 = vadd.f32 %v206_v28, %v188_v26  ;;  %v258_v28 = vmul.f32 %v254_v16, %v1555_v8  ;;  %v1581_v26 = vld [vmem:[#allocation3 + $0x98] sm:$0xff]  ;;  %v227_v43 = vadd.f32 %v225_v38, %v209_v40  ;;  %v1597_v8 = vld [vmem:[#allocation3 + $0xa8] sm:$0xff]  ;;  %v293_v40 = vmul.f32 %v289_v46, %v1587_v35 }
  0xe5   :  { %v1523_v6 = vpop.permute.xlu1 %441  ;;  %v277_v38 = vmul.f32 %v273_v42, %v1581_v26  ;;  %v307_v51 = vsel %vm271_vm2, %v1357_v52, %v1367_v55  ;;  %v324_v53 = vsel %vm323_vm3, %v1365_v54, %v1375_v57  ;;  %v310_v46 = vmul.f32 %v306_v47, %v1603_v37  ;;  %v1645_v47 = vld [vmem:[#allocation3 + $0xd8] sm:$0xff] }
  0xe6   :  { %778 = vrot.lane.b32.xlu0 %v1329_v44, %s1054_s0  ;;  %v226_v5 = vadd.f32 %v224_v31, %v208_v32  ;;  %v276_v32 = vmul.f32 %v272_v39, %v1571_v25  ;;  %v244_v48 = vadd.f32 %v242_v14, %v227_v43  ;;  %v294_v39 = vmul.f32 %v290_v45, %v1597_v8  ;;  %v1635_v45 = vld [vmem:[#allocation3 + $0xd0] sm:$0xff] }
  0xe7   :  { %794 = vrot.lane.b32.xlu1 %v1347_v49, %s1054_s0  ;;  %v325_v52 = vsel %vm323_vm3, %v1375_v57, %v1373_v56  ;;  %2034 = vst [vmem:[#allocation26_spill] sm:$0xff] %v1635_v45  ;;  %v341_v54 = vsel %vm323_vm3, %v1383_v59, %v1381_v58  ;;  %2035 = vst [vmem:[#allocation27_spill] sm:$0xff] %v1645_v47  ;;  %v342_v56 = vsel %vm323_vm3, %v1381_v58, %v1391_v61  ;;  %v1651_v59 = vld [vmem:[#allocation3 + $0xe0] sm:$0xff] }
  0xe8   :  { %v1525_v19 = vpop.permute.xlu0 %439  ;;  %v243_v16 = vadd.f32 %v241_v13, %v226_v5  ;;  %v261_v14 = vadd.f32 %v259_v33, %v244_v48  ;;  %v1619_v5 = vld [vmem:[#allocation3 + $0xc0] sm:$0xff]  ;;  %v311_v33 = vmul.f32 %v307_v51, %v1613_v50  ;;  %2036 = vst [vmem:[#allocation28_spill] sm:$0xff] %v1651_v59  ;;  %v359_v58 = vsel %vm323_vm3, %v1399_v63, %v1397_v62 }
  0xe9   :  { %v1560_v22 = vpop.permute.xlu1 %456  ;;  %2032 = vst [vmem:[#allocation24_spill] sm:$0xff] %v1619_v5  ;;  %v328_v48 = vmul.f32 %v324_v53, %v1619_v5  ;;  %v345_v53 = vmul.f32 %v341_v54, %v1635_v45  ;;  %v2040_v62 = vld [vmem:[#allocation8_spill] sm:$0xff]  ;;  %v2043_v5 = vld [vmem:[#allocation11_spill] sm:$0xff] }
  0xea   :  { %792 = vrot.lane.b32.xlu0 %v1163_v23, %s1054_s0  ;;  %v260_v13 = vadd.f32 %v258_v28, %v243_v16  ;;  %v1629_v16 = vld [vmem:[#allocation3 + $0xc8] sm:$0xff]  ;;  %v279_v55 = vadd.f32 %v277_v38, %v261_v14 }
  0xeb   :  { %808 = vrot.lane.b32.xlu1 %v1137_v17, %s1055_s13  ;;  %2033 = vst [vmem:[#allocation25_spill] sm:$0xff] %v1629_v16  ;;  %v329_v38 = vmul.f32 %v325_v52, %v1629_v16  ;;  %v1667_v52 = vld [vmem:[#allocation3 + $0xf0] sm:$0xff] }
  0xec   :  { %v1562_v29 = vpop.permute.xlu0 %443  ;;  %v278_v43 = vadd.f32 %v276_v32, %v260_v13  ;;  %v296_v57 = vadd.f32 %v294_v39, %v279_v55  ;;  %v358_v13 = vsel %vm323_vm3, %v1389_v60, %v1399_v63  ;;  %v346_v39 = vmul.f32 %v342_v56, %v1645_v47  ;;  %2037 = vst [vmem:[#allocation29_spill] sm:$0xff] %v1667_v52  ;;  %v2038_v60 = vld [vmem:[#allocation6_spill] sm:$0xff]  ;;  %v2042_v47 = vld [vmem:[#allocation7_spill] sm:$0xff] }
  0xed   :  { %v1592_v36 = vpop.permute.xlu1 %460  ;;  %v376_v55 = vsel %vm375_vm4, %v2038_v60, %v1405_v0  ;;  %v362_v54 = vmul.f32 %v358_v13, %v1651_v59  ;;  %v377_v63 = vsel %vm375_vm4, %v1405_v0, %v2040_v62  ;;  %v2041_v60 = vld [vmem:[#allocation12_spill] sm:$0xff]  ;;  %v1693_v59 = vld [vmem:[#allocation3 + $0x108] sm:$0xff] }
  0xee   :  { %806 = vrot.lane.b32.xlu0 %v1139_v18, %s1055_s13  ;;  %v295_v32 = vadd.f32 %v293_v40, %v278_v43  ;;  %v1661_v43 = vld [vmem:[#allocation3 + $0xe8] sm:$0xff]  ;;  %v313_v61 = vadd.f32 %v311_v33, %v296_v57  ;;  %v1683_v57 = vld [vmem:[#allocation3 + $0x100] sm:$0xff]  ;;  %v393_v45 = vsel %vm375_vm4, %v2042_v47, %v2041_v60  ;;  %v394_v0 = vsel %vm375_vm4, %v2041_v60, %v2043_v5  ;;  %v1709_v5 = vld [vmem:[#allocation3 + $0x118] sm:$0xff] }
  0xef   :  { %822 = vrot.lane.b32.xlu1 %v1148_v20, %s1055_s13  ;;  %v363_v56 = vmul.f32 %v359_v58, %v1661_v43  ;;  %v2044_v47 = vld [vmem:[#allocation17_spill] sm:$0xff]  ;;  %v2045_v60 = vld [vmem:[#allocation20_spill] sm:$0xff] }
  0xf0   :  { %v1594_v31 = vpop.permute.xlu0 %458  ;;  %v312_v14 = vadd.f32 %v310_v46, %v295_v32  ;;  %v1677_v32 = vld [vmem:[#allocation3 + $0xf8] sm:$0xff]  ;;  %v331_v33 = vadd.f32 %v329_v38, %v313_v61  ;;  %v1699_v61 = vld [vmem:[#allocation3 + $0x110] sm:$0xff]  ;;  %v410_v62 = vsel %vm375_vm4, %v2044_v47, %v1454_v2  ;;  %v428_v47 = vsel %vm427_vm5, %v2045_v60, %v1504_v7 }
  0xf1   :  { %v1624_v42 = vpop.permute.xlu1 %475  ;;  %2039 = vst [vmem:[#allocation6_spill] sm:$0xff] %v1677_v32  ;;  %v381_v58 = vmul.f32 %v377_v63, %v1677_v32  ;;  %v398_v63 = vmul.f32 %v394_v0, %v1693_v59  ;;  %v1727_v0 = vld [vmem:[#allocation3 + $0x130] sm:$0xff] }
  0xf2   :  { %810 = vrot.lane.b32.xlu0 %v1319_v41, %s1055_s13  ;;  %v330_v46 = vadd.f32 %v328_v48, %v312_v14  ;;  %v380_v14 = vmul.f32 %v376_v55, %v1667_v52  ;;  %v348_v38 = vadd.f32 %v346_v39, %v331_v33  ;;  %v397_v55 = vmul.f32 %v393_v45, %v1683_v57  ;;  %v1715_v33 = vld [vmem:[#allocation3 + $0x120] sm:$0xff] }
  0xf3   :  { %826 = vrot.lane.b32.xlu1 %v1329_v44, %s1055_s13  ;;  %v411_v39 = vsel %vm375_vm4, %v1454_v2, %v1473_v9  ;;  %v414_v45 = vmul.f32 %v410_v62, %v1699_v61  ;;  %v429_v2 = vsel %vm427_vm5, %v1504_v7, %v1502_v30  ;;  %v432_v62 = vmul.f32 %v428_v47, %v1715_v33 }
  0xf4   :  { %v1626_v28 = vpop.permute.xlu0 %473  ;;  %v347_v13 = vadd.f32 %v345_v53, %v330_v46  ;;  %v365_v46 = vadd.f32 %v363_v56, %v348_v38  ;;  %v415_v56 = vmul.f32 %v411_v39, %v1709_v5  ;;  %v445_v38 = vsel %vm427_vm5, %v1525_v19, %v1523_v6  ;;  %v1743_v19 = vld [vmem:[#allocation3 + $0x140] sm:$0xff] }
  0xf5   :  { %v1656_v51 = vpop.permute.xlu1 %491  ;;  %v446_v30 = vsel %vm427_vm5, %v1523_v6, %v1562_v29  ;;  %v462_v39 = vsel %vm427_vm5, %v1560_v22, %v1594_v31  ;;  %v449_v47 = vmul.f32 %v445_v38, %v1727_v0  ;;  %v463_v6 = vsel %vm427_vm5, %v1594_v31, %v1592_v36  ;;  %v1765_v38 = vld [vmem:[#allocation3 + $0x158] sm:$0xff] }
  0xf6   :  { %824 = vrot.lane.b32.xlu0 %v1154_v21, %s1055_s13  ;;  %v364_v53 = vadd.f32 %v362_v54, %v347_v13  ;;  %v1721_v13 = vld [vmem:[#allocation3 + $0x128] sm:$0xff]  ;;  %v383_v9 = vadd.f32 %v381_v58, %v365_v46  ;;  %v480_v22 = vsel %vm479_vm6, %v1626_v28, %v1624_v42  ;;  %2048 = vst [vmem:[#allocation7_spill] sm:$0xff] %v1765_v38 }
  0xf7   :  { %840 = vrot.lane.b32.xlu1 %v1163_v23, %s1055_s13  ;;  %v433_v58 = vmul.f32 %v429_v2, %v1721_v13  ;;  %v1755_v2 = vld [vmem:[#allocation3 + $0x150] sm:$0xff] }
  0xf8   :  { %v1658_v40 = vpop.permute.xlu0 %477  ;;  %v382_v54 = vadd.f32 %v380_v14, %v364_v53  ;;  %v1737_v53 = vld [vmem:[#allocation3 + $0x138] sm:$0xff]  ;;  %v400_v7 = vadd.f32 %v398_v63, %v383_v9  ;;  %2047 = vst [vmem:[#allocation12_spill] sm:$0xff] %v1755_v2  ;;  %v466_v9 = vmul.f32 %v462_v39, %v1743_v19  ;;  %v484_v39 = vmul.f32 %v480_v22, %v1755_v2 }
  0xf9   :  { %v1688_v16 = vpop.permute.xlu1 %495  ;;  %v450_v63 = vmul.f32 %v446_v30, %v1737_v53  ;;  %v481_v36 = vsel %vm479_vm6, %v1624_v42, %v1658_v40  ;;  %v1791_v22 = vld [vmem:[#allocation3 + $0x178] sm:$0xff] }
  0xfa   :  { %838 = vrot.lane.b32.xlu0 %v1165_v24, %s1055_s13  ;;  %v399_v14 = vadd.f32 %v397_v55, %v382_v54  ;;  %v1749_v54 = vld [vmem:[#allocation3 + $0x148] sm:$0xff]  ;;  %v417_v29 = vadd.f32 %v415_v56, %v400_v7 }
  0xfb   :  { %854 = vrot.lane.b32.xlu1 %v1139_v18, %s1056_s14  ;;  %2046 = vst [vmem:[#allocation8_spill] sm:$0xff] %v1749_v54  ;;  %v467_v56 = vmul.f32 %v463_v6, %v1749_v54  ;;  %v1783_v6 = vld [vmem:[#allocation3 + $0x170] sm:$0xff]  ;;  %v1799_v54 = vld [vmem:[#allocation3 + $0x188] sm:$0xff] }
  0xfc   :  { %v1690_v48 = vpop.permute.xlu0 %493  ;;  %v416_v60 = vadd.f32 %v414_v45, %v399_v14  ;;  %v435_v31 = vadd.f32 %v433_v58, %v417_v29  ;;  %v1771_v14 = vld [vmem:[#allocation3 + $0x160] sm:$0xff]  ;;  %v485_v58 = vmul.f32 %v481_v36, %v1765_v38  ;;  %2049 = vst [vmem:[#allocation11_spill] sm:$0xff] %v1799_v54 }
  0xfd   :  { %v511_v32 = vpop.permute.xlu1 %510  ;;  %v497_v28 = vsel %vm479_vm6, %v1656_v51, %v1690_v48  ;;  %v498_v42 = vsel %vm479_vm6, %v1690_v48, %v1688_v16 }
  0xfe   :  { %842 = vrot.lane.b32.xlu0 %v1347_v49, %s1055_s13  ;;  %v434_v45 = vadd.f32 %v432_v62, %v416_v60  ;;  %v1777_v60 = vld [vmem:[#allocation3 + $0x168] sm:$0xff]  ;;  %v452_v40 = vadd.f32 %v450_v63, %v435_v31 }
  0xff   :  { %858 = vrot.lane.b32.xlu1 %v1319_v41, %s1056_s14  ;;  %v502_v63 = vmul.f32 %v498_v42, %v1777_v60 }
 0x100   :  { %v509_v52 = vpop.permute.xlu0 %508  ;;  %v451_v62 = vadd.f32 %v449_v47, %v434_v45  ;;  %v501_v47 = vmul.f32 %v497_v28, %v1771_v14  ;;  %v469_v48 = vadd.f32 %v467_v56, %v452_v40  ;;  %v1795_v45 = vld [vmem:[#allocation3 + $0x180] sm:$0xff] }
 0x101   :  { %v526_v46 = vpop.permute.xlu1 %525  ;;  %v514_v29 = vsel %vm479_vm6, %v509_v52, %v511_v32 }
 0x102   :  { %856 = vrot.lane.b32.xlu0 %v1137_v17, %s1056_s14  ;;  %v468_v51 = vadd.f32 %v466_v9, %v451_v62  ;;  %v518_v2 = vmul.f32 %v514_v29, %v1783_v6  ;;  %v487_v28 = vadd.f32 %v485_v58, %v469_v48  ;;  %v2052_v58 = vld [vmem:[#allocation10_spill] sm:$0xff] }
 0x103   :  { %872 = vrot.lane.b32.xlu1 %v1154_v21, %s1056_s14  ;;  %v584_v29 = vmul.f32 %v2052_v58, %v1139_v18 }
 0x104   :  { %v513_v55 = vpop.permute.xlu0 %512  ;;  %v486_v38 = vadd.f32 %v484_v39, %v468_v51  ;;  %v1811_v39 = vld [vmem:[#allocation3 + $0x198] sm:$0xff]  ;;  %v504_v42 = vadd.f32 %v502_v63, %v487_v28  ;;  %v2053_v51 = vld [vmem:[#allocation9_spill] sm:$0xff] }
 0x105   :  { %v530_v30 = vpop.permute.xlu1 %529  ;;  %v515_v16 = vsel %vm479_vm6, %v511_v32, %v513_v55  ;;  %v1803_v32 = vld [vmem:[#allocation3 + $0x190] sm:$0xff]  ;;  %2051 = vst [vmem:[#allocation20_spill] sm:$0xff] %v1811_v39  ;;  %v1827_v28 = vld [vmem:[#allocation3 + $0x1a8] sm:$0xff] }
 0x106   :  { %870 = vrot.lane.b32.xlu0 %v1148_v20, %s1056_s14  ;;  %v519_v62 = vmul.f32 %v515_v16, %v1791_v22  ;;  %2050 = vst [vmem:[#allocation17_spill] sm:$0xff] %v1803_v32  ;;  %v585_v16 = vmul.f32 %v2053_v51, %v1137_v17  ;;  %2055 = vst [vmem:[#allocation9_spill] sm:$0xff] %v1827_v28 }
 0x107   :  { %886 = vrot.lane.b32.xlu1 %v1165_v24, %s1056_s14 }
 0x108   :  { %v528_v7 = vpop.permute.xlu0 %527 }
 0x109   :  { %v532_v52 = vsel %vm531_vm7, %v526_v46, %v528_v7  ;;  %v546_v36 = vpop.permute.xlu1 %545  ;;  %v533_v9 = vsel %vm531_vm7, %v528_v7, %v530_v30  ;;  %v503_v46 = vadd.f32 %v501_v47, %v486_v38  ;;  %v521_v47 = vadd.f32 %v519_v62, %v504_v42  ;;  %v2058_v42 = vld [vmem:[#allocation13_spill] sm:$0xff] }
 0x10a   :  { %874 = vrot.lane.b32.xlu0 %v1329_v44, %s1056_s14  ;;  %v536_v56 = vmul.f32 %v532_v52, %v1795_v45  ;;  %v537_v30 = vmul.f32 %v533_v9, %v1799_v54  ;;  %v1825_v9 = vld [vmem:[#allocation3 + $0x1a0] sm:$0xff] }
 0x10b   :  { %890 = vrot.lane.b32.xlu1 %v1347_v49, %s1056_s14  ;;  %v520_v48 = vadd.f32 %v518_v2, %v503_v46  ;;  %2054 = vst [vmem:[#allocation10_spill] sm:$0xff] %v1825_v9 }
 0x10c   :  { %v544_v31 = vpop.permute.xlu0 %543  ;;  %v539_v58 = vadd.f32 %v537_v30, %v521_v47 }
 0x10d   :  { %v549_v55 = vsel %vm531_vm7, %v544_v31, %v546_v36  ;;  %v561_v7 = vpop.permute.xlu1 %560  ;;  %v538_v63 = vadd.f32 %v536_v56, %v520_v48  ;;  %v2059_v56 = vld [vmem:[#allocation14_spill] sm:$0xff] }
 0x10e   :  { %888 = vrot.lane.b32.xlu0 %v1163_v23, %s1056_s14  ;;  %v553_v31 = vmul.f32 %v549_v55, %v1803_v32  ;;  %v2056_v55 = vld [vmem:[#allocation15_spill] sm:$0xff]  ;;  %v591_v48 = vmul.f32 %v2059_v56, %v1154_v21 }
 0x10f   :  { %904 = vrot.lane.b32.xlu1 %v1137_v17, %s1057_s15  ;;  %v586_v51 = vadd.f32 %v584_v29, %v2056_v55 }
 0x110   :  { %v548_v40 = vpop.permute.xlu0 %547 }
 0x111   :  { %v550_v38 = vsel %vm531_vm7, %v546_v36, %v548_v40  ;;  %v565_v2 = vpop.permute.xlu1 %564  ;;  %v2057_v36 = vld [vmem:[#allocation16_spill] sm:$0xff]  ;;  %v587_v40 = vadd.f32 %v585_v16, %v2058_v42 }
 0x112   :  { %v554_v52 = vmul.f32 %v550_v38, %v1811_v39  ;;  %902 = vrot.lane.b32.xlu0 %v1139_v18, %s1057_s15  ;;  %v590_v62 = vmul.f32 %v2057_v36, %v1148_v20  ;;  %v555_v38 = vadd.f32 %v553_v31, %v538_v63 }
 0x113   :  { %918 = vrot.lane.b32.xlu1 %v1148_v20, %s1057_s15 }
 0x114   :  { %v563_v46 = vpop.permute.xlu0 %562  ;;  %v556_v54 = vadd.f32 %v554_v52, %v539_v58  ;;  %v592_v63 = vadd.f32 %v590_v62, %v586_v51 }
 0x115   :  { %v566_v39 = vsel %vm531_vm7, %v561_v7, %v563_v46  ;;  %v567_v32 = vsel %vm531_vm7, %v563_v46, %v565_v2  ;;  %v611_v31 = vpop.permute.xlu1 %610  ;;  %v2060_v2 = vld [vmem:[#allocation19_spill] sm:$0xff] }
 0x116   :  { %v570_v30 = vmul.f32 %v566_v39, %v1825_v9  ;;  %v571_v47 = vmul.f32 %v567_v32, %v1827_v28  ;;  %906 = vrot.lane.b32.xlu0 %v1319_v41, %s1057_s15  ;;  %v596_v46 = vmul.f32 %v2060_v2, %v1165_v24  ;;  %v2061_v32 = vld [vmem:[#allocation18_spill] sm:$0xff] }
 0x117   :  { %922 = vrot.lane.b32.xlu1 %v1329_v44, %s1057_s15  ;;  %v597_v39 = vmul.f32 %v2061_v32, %v1163_v23 }
 0x118   :  { %v572_v29 = vadd.f32 %v570_v30, %v555_v38  ;;  %v573_v16 = vadd.f32 %v571_v47, %v556_v54  ;;  %v609_v7 = vpop.permute.xlu0 %608  ;;  %v593_v54 = vadd.f32 %v591_v48, %v587_v40  ;;  %v598_v51 = vadd.f32 %v596_v46, %v592_v63 }
 0x119   :  { %v614_v52 = vsel %vm161_vm0, %v609_v7, %v611_v31  ;;  %v628_v58 = vpop.permute.xlu1 %627 }
 0x11a   :  { %574 = vst [vmem:[%s1986_s3] sm:$0xff] %v572_v29  ;;  %575 = vst [vmem:[%s1986_s3 + $0x8] sm:$0xff] %v573_v16  ;;  %920 = vrot.lane.b32.xlu0 %v1154_v21, %s1057_s15  ;;  %v618_v36 = vmul.f32 %v614_v52, %v1482_v10  ;;  %v599_v42 = vadd.f32 %v597_v39, %v593_v54  ;;  %v2062_v10 = vld [vmem:[#allocation22_spill] sm:$0xff] }
 0x11b   :  { %936 = vrot.lane.b32.xlu1 %v1163_v23, %s1057_s15 }
 0x11c   :  { %v613_v55 = vpop.permute.xlu0 %612  ;;  %v620_v48 = vadd.f32 %v618_v36, %v598_v51 }
 0x11d   :  { %v615_v62 = vsel %vm161_vm0, %v611_v31, %v613_v55  ;;  %v632_v40 = vpop.permute.xlu1 %631  ;;  %v2063_v31 = vld [vmem:[#allocation21_spill] sm:$0xff] }
 0x11e   :  { %v619_v38 = vmul.f32 %v615_v62, %v1477_v11  ;;  %934 = vrot.lane.b32.xlu0 %v1165_v24, %s1057_s15 }
 0x11f   :  { %950 = vrot.lane.b32.xlu1 %v1139_v18, %s1058_s16 }
 0x120   :  { %v630_v56 = vpop.permute.xlu0 %629  ;;  %v621_v29 = vadd.f32 %v619_v38, %v599_v42 }
 0x121   :  { %v633_v30 = vsel %vm161_vm0, %v628_v58, %v630_v56  ;;  %v634_v47 = vsel %vm161_vm0, %v630_v56, %v632_v40  ;;  %v649_v2 = vpop.permute.xlu1 %648 }
 0x122   :  { %v637_v16 = vmul.f32 %v633_v30, %v2062_v10  ;;  %v638_v7 = vmul.f32 %v634_v47, %v2063_v31  ;;  %938 = vrot.lane.b32.xlu0 %v1347_v49, %s1057_s15 }
 0x123   :  { %954 = vrot.lane.b32.xlu1 %v1319_v41, %s1058_s16 }
 0x124   :  { %v639_v11 = vadd.f32 %v637_v16, %v620_v48  ;;  %v640_v63 = vadd.f32 %v638_v7, %v621_v29  ;;  %v647_v46 = vpop.permute.xlu0 %646  ;;  %v2064_v16 = vld [vmem:[#allocation23_spill] sm:$0xff] }
 0x125   :  { %v652_v52 = vsel %vm161_vm0, %v647_v46, %v649_v2  ;;  %v663_v39 = vpop.permute.xlu1 %662 }
 0x126   :  { %v656_v54 = vmul.f32 %v652_v52, %v1508_v27  ;;  %952 = vrot.lane.b32.xlu0 %v1137_v17, %s1058_s16 }
 0x127   :  { %968 = vrot.lane.b32.xlu1 %v1154_v21, %s1058_s16 }
 0x128   :  { %v658_v32 = vadd.f32 %v656_v54, %v639_v11  ;;  %v651_v18 = vpop.permute.xlu0 %650 }
 0x129   :  { %v653_v58 = vsel %vm161_vm0, %v649_v2, %v651_v18  ;;  %v667_v51 = vpop.permute.xlu1 %666 }
 0x12a   :  { %v657_v55 = vmul.f32 %v653_v58, %v1527_v34  ;;  %966 = vrot.lane.b32.xlu0 %v1148_v20, %s1058_s16 }
 0x12b   :  { %982 = vrot.lane.b32.xlu1 %v1165_v24, %s1058_s16 }
 0x12c   :  { %v659_v27 = vadd.f32 %v657_v55, %v640_v63  ;;  %v665_v36 = vpop.permute.xlu0 %664 }
 0x12d   :  { %v668_v41 = vsel %vm219_vm1, %v663_v39, %v665_v36  ;;  %v669_v17 = vsel %vm219_vm1, %v665_v36, %v667_v51  ;;  %v681_v20 = vpop.permute.xlu1 %680 }
 0x12e   :  { %v672_v62 = vmul.f32 %v668_v41, %v1518_v12  ;;  %v673_v42 = vmul.f32 %v669_v17, %v1533_v4  ;;  %970 = vrot.lane.b32.xlu0 %v1329_v44, %s1058_s16 }
 0x12f   :  { %986 = vrot.lane.b32.xlu1 %v1347_v49, %s1058_s16 }
 0x130   :  { %v674_v21 = vadd.f32 %v672_v62, %v658_v32  ;;  %v675_v34 = vadd.f32 %v673_v42, %v659_v27  ;;  %v679_v38 = vpop.permute.xlu0 %678 }
 0x131   :  { %v684_v40 = vsel %vm219_vm1, %v679_v38, %v681_v20  ;;  %v695_v4 = vpop.permute.xlu1 %694 }
 0x132   :  { %v688_v56 = vmul.f32 %v684_v40, %v1538_v15  ;;  %984 = vrot.lane.b32.xlu0 %v1163_v23, %s1058_s16 }
 0x134   :  { %v690_v12 = vadd.f32 %v688_v56, %v674_v21  ;;  %v683_v24 = vpop.permute.xlu0 %682 }
 0x135   :  { %v685_v48 = vsel %vm219_vm1, %v681_v20, %v683_v24  ;;  %v699_v47 = vpop.permute.xlu1 %698 }
 0x136   :  { %v689_v44 = vmul.f32 %v685_v48, %v1548_v1 }
 0x138   :  { %v691_v30 = vadd.f32 %v689_v44, %v675_v34  ;;  %v697_v29 = vpop.permute.xlu0 %696 }
 0x139   :  { %v700_v10 = vsel %vm219_vm1, %v695_v4, %v697_v29  ;;  %v701_v15 = vsel %vm219_vm1, %v697_v29, %v699_v47  ;;  %v713_v11 = vpop.permute.xlu1 %712 }
 0x13a   :  { %v704_v31 = vmul.f32 %v700_v10, %v2064_v16  ;;  %v705_v49 = vmul.f32 %v701_v15, %v1565_v3 }
 0x13c   :  { %v706_v7 = vadd.f32 %v704_v31, %v690_v12  ;;  %v707_v23 = vadd.f32 %v705_v49, %v691_v30  ;;  %v711_v63 = vpop.permute.xlu0 %710 }
 0x13d   :  { %v716_v2 = vsel %vm271_vm2, %v711_v63, %v713_v11  ;;  %v727_v52 = vpop.permute.xlu1 %726 }
 0x13e   :  { %v720_v46 = vmul.f32 %v716_v2, %v1571_v25 }
 0x140   :  { %v722_v1 = vadd.f32 %v720_v46, %v706_v7  ;;  %v715_v54 = vpop.permute.xlu0 %714 }
 0x141   :  { %v717_v32 = vsel %vm271_vm2, %v713_v11, %v715_v54  ;;  %v731_v58 = vpop.permute.xlu1 %730 }
 0x142   :  { %v721_v39 = vmul.f32 %v717_v32, %v1581_v26 }
 0x144   :  { %v723_v18 = vadd.f32 %v721_v39, %v707_v23  ;;  %v729_v55 = vpop.permute.xlu0 %728 }
 0x145   :  { %v732_v3 = vsel %vm271_vm2, %v727_v52, %v729_v55  ;;  %v733_v27 = vsel %vm271_vm2, %v729_v55, %v731_v58  ;;  %v745_v17 = vpop.permute.xlu1 %744 }
 0x146   :  { %v736_v51 = vmul.f32 %v732_v3, %v1587_v35  ;;  %v737_v36 = vmul.f32 %v733_v27, %v1597_v8  ;;  %v2065_v27 = vld [vmem:[#allocation24_spill] sm:$0xff] }
 0x148   :  { %v738_v41 = vadd.f32 %v736_v51, %v722_v1  ;;  %v739_v25 = vadd.f32 %v737_v36, %v723_v18  ;;  %v743_v62 = vpop.permute.xlu0 %742  ;;  %v2066_v36 = vld [vmem:[#allocation25_spill] sm:$0xff] }
 0x149   :  { %v759_v42 = vpop.permute.xlu1 %758  ;;  %v748_v46 = vsel %vm271_vm2, %v743_v62, %v745_v17 }
 0x14a   :  { %v752_v18 = vmul.f32 %v748_v46, %v1603_v37  ;;  %v2068_v46 = vld [vmem:[#allocation27_spill] sm:$0xff] }
 0x14c   :  { %v747_v21 = vpop.permute.xlu0 %746  ;;  %v754_v9 = vadd.f32 %v752_v18, %v738_v41  ;;  %v2070_v18 = vld [vmem:[#allocation29_spill] sm:$0xff] }
 0x14d   :  { %v763_v34 = vpop.permute.xlu1 %762  ;;  %v749_v1 = vsel %vm271_vm2, %v745_v17, %v747_v21 }
 0x14e   :  { %v753_v58 = vmul.f32 %v749_v1, %v1613_v50 }
 0x150   :  { %v761_v20 = vpop.permute.xlu0 %760 }
 0x151   :  { %v777_v26 = vpop.permute.xlu1 %776  ;;  %v764_v32 = vsel %vm323_vm3, %v759_v42, %v761_v20  ;;  %v765_v39 = vsel %vm323_vm3, %v761_v20, %v763_v34  ;;  %v755_v34 = vadd.f32 %v753_v58, %v739_v25  ;;  %v2067_v20 = vld [vmem:[#allocation26_spill] sm:$0xff] }
 0x152   :  { %v768_v51 = vmul.f32 %v764_v32, %v2065_v27  ;;  %v769_v62 = vmul.f32 %v765_v39, %v2066_v36  ;;  %v2069_v32 = vld [vmem:[#allocation28_spill] sm:$0xff] }
 0x154   :  { %v775_v38 = vpop.permute.xlu0 %774  ;;  %v771_v1 = vadd.f32 %v769_v62, %v755_v34 }
 0x155   :  { %v791_v40 = vpop.permute.xlu1 %790  ;;  %v780_v55 = vsel %vm323_vm3, %v775_v38, %v777_v26 }
 0x156   :  { %v784_v37 = vmul.f32 %v780_v55, %v2067_v20  ;;  %v2071_v55 = vld [vmem:[#allocation6_spill] sm:$0xff] }
 0x158   :  { %v779_v56 = vpop.permute.xlu0 %778 }
 0x159   :  { %v795_v12 = vpop.permute.xlu1 %794  ;;  %v781_v3 = vsel %vm323_vm3, %v777_v26, %v779_v56  ;;  %v770_v56 = vadd.f32 %v768_v51, %v754_v9 }
 0x15a   :  { %v785_v50 = vmul.f32 %v781_v3, %v2068_v46 }
 0x15b   :  { %v786_v25 = vadd.f32 %v784_v37, %v770_v56 }
 0x15c   :  { %v793_v4 = vpop.permute.xlu0 %792 }
 0x15d   :  { %v809_v24 = vpop.permute.xlu1 %808  ;;  %v796_v21 = vsel %vm323_vm3, %v791_v40, %v793_v4  ;;  %v797_v42 = vsel %vm323_vm3, %v793_v4, %v795_v12  ;;  %v787_v4 = vadd.f32 %v785_v50, %v771_v1 }
 0x15e   :  { %v800_v39 = vmul.f32 %v796_v21, %v2069_v32  ;;  %v801_v27 = vmul.f32 %v797_v42, %v1661_v43 }
 0x160   :  { %v807_v48 = vpop.permute.xlu0 %806  ;;  %v803_v3 = vadd.f32 %v801_v27, %v787_v4  ;;  %v2074_v27 = vld [vmem:[#allocation7_spill] sm:$0xff] }
 0x161   :  { %v823_v44 = vpop.permute.xlu1 %822  ;;  %v812_v38 = vsel %vm375_vm4, %v807_v48, %v809_v24 }
 0x162   :  { %v816_v58 = vmul.f32 %v812_v38, %v2070_v18 }
 0x164   :  { %v811_v35 = vpop.permute.xlu0 %810 }
 0x165   :  { %v827_v30 = vpop.permute.xlu1 %826  ;;  %v813_v26 = vsel %vm375_vm4, %v809_v24, %v811_v35  ;;  %v802_v35 = vadd.f32 %v800_v39, %v786_v25  ;;  %v2073_v39 = vld [vmem:[#allocation12_spill] sm:$0xff] }
 0x166   :  { %v817_v48 = vmul.f32 %v813_v26, %v2071_v55  ;;  %v2072_v26 = vld [vmem:[#allocation8_spill] sm:$0xff] }
 0x167   :  { %v818_v21 = vadd.f32 %v816_v58, %v802_v35 }
 0x168   :  { %v825_v8 = vpop.permute.xlu0 %824  ;;  %v819_v42 = vadd.f32 %v817_v48, %v803_v3  ;;  %v2075_v3 = vld [vmem:[#allocation11_spill] sm:$0xff] }
 0x169   :  { %v841_v47 = vpop.permute.xlu1 %840  ;;  %v828_v12 = vsel %vm375_vm4, %v823_v44, %v825_v8  ;;  %v829_v41 = vsel %vm375_vm4, %v825_v8, %v827_v30 }
 0x16a   :  { %v832_v43 = vmul.f32 %v828_v12, %v1683_v57  ;;  %v833_v51 = vmul.f32 %v829_v41, %v1693_v59 }
 0x16c   :  { %v839_v29 = vpop.permute.xlu0 %838  ;;  %v834_v20 = vadd.f32 %v832_v43, %v818_v21  ;;  %v835_v57 = vadd.f32 %v833_v51, %v819_v42  ;;  %v2077_v42 = vld [vmem:[#allocation20_spill] sm:$0xff] }
 0x16d   :  { %v855_v10 = vpop.permute.xlu1 %854  ;;  %v844_v24 = vsel %vm375_vm4, %v839_v29, %v841_v47 }
 0x16e   :  { %v848_v34 = vmul.f32 %v844_v24, %v1699_v61 }
 0x170   :  { %v843_v15 = vpop.permute.xlu0 %842  ;;  %v850_v50 = vadd.f32 %v848_v34, %v834_v20 }
 0x171   :  { %v859_v16 = vpop.permute.xlu1 %858  ;;  %v845_v9 = vsel %vm375_vm4, %v841_v47, %v843_v15 }
 0x172   :  { %v849_v29 = vmul.f32 %v845_v9, %v1709_v5 }
 0x174   :  { %v857_v31 = vpop.permute.xlu0 %856  ;;  %v851_v61 = vadd.f32 %v849_v29, %v835_v57 }
 0x175   :  { %v873_v49 = vpop.permute.xlu1 %872  ;;  %v860_v30 = vsel %vm427_vm5, %v855_v10, %v857_v31  ;;  %v861_v8 = vsel %vm427_vm5, %v857_v31, %v859_v16 }
 0x176   :  { %v864_v59 = vmul.f32 %v860_v30, %v1715_v33  ;;  %v865_v37 = vmul.f32 %v861_v8, %v1721_v13  ;;  %v2076_v8 = vld [vmem:[#allocation17_spill] sm:$0xff] }
 0x178   :  { %v871_v7 = vpop.permute.xlu0 %870  ;;  %v866_v38 = vadd.f32 %v864_v59, %v850_v50  ;;  %v867_v33 = vadd.f32 %v865_v37, %v851_v61  ;;  %v2078_v59 = vld [vmem:[#allocation10_spill] sm:$0xff] }
 0x179   :  { %v887_v23 = vpop.permute.xlu1 %886  ;;  %v876_v47 = vsel %vm427_vm5, %v871_v7, %v873_v49 }
 0x17a   :  { %v880_v5 = vmul.f32 %v876_v47, %v1727_v0 }
 0x17c   :  { %v875_v11 = vpop.permute.xlu0 %874  ;;  %v882_v32 = vadd.f32 %v880_v5, %v866_v38 }
 0x17d   :  { %v891_v63 = vpop.permute.xlu1 %890  ;;  %v877_v15 = vsel %vm427_vm5, %v873_v49, %v875_v11 }
 0x17e   :  { %v881_v7 = vmul.f32 %v877_v15, %v1737_v53 }
 0x180   :  { %v889_v2 = vpop.permute.xlu0 %888  ;;  %v883_v0 = vadd.f32 %v881_v7, %v867_v33 }
 0x181   :  { %v905_v52 = vpop.permute.xlu1 %904  ;;  %v892_v16 = vsel %vm427_vm5, %v887_v23, %v889_v2  ;;  %v893_v31 = vsel %vm427_vm5, %v889_v2, %v891_v63 }
 0x182   :  { %v896_v13 = vmul.f32 %v892_v16, %v1743_v19  ;;  %v897_v56 = vmul.f32 %v893_v31, %v2072_v26 }
 0x184   :  { %v903_v54 = vpop.permute.xlu0 %902  ;;  %v898_v12 = vadd.f32 %v896_v13, %v882_v32  ;;  %v899_v19 = vadd.f32 %v897_v56, %v883_v0 }
 0x185   :  { %v919_v28 = vpop.permute.xlu1 %918  ;;  %v908_v49 = vsel %vm479_vm6, %v903_v54, %v905_v52 }
 0x186   :  { %v912_v53 = vmul.f32 %v908_v49, %v2073_v39 }
 0x188   :  { %v907_v17 = vpop.permute.xlu0 %906  ;;  %v914_v18 = vadd.f32 %v912_v53, %v898_v12 }
 0x189   :  { %v923_v36 = vpop.permute.xlu1 %922  ;;  %v909_v11 = vsel %vm479_vm6, %v905_v52, %v907_v17 }
 0x18a   :  { %v913_v54 = vmul.f32 %v909_v11, %v2074_v27 }
 0x18c   :  { %v921_v40 = vpop.permute.xlu0 %920  ;;  %v915_v58 = vadd.f32 %v913_v54, %v899_v19 }
 0x18d   :  { %v937_v62 = vpop.permute.xlu1 %936  ;;  %v924_v63 = vsel %vm479_vm6, %v919_v28, %v921_v40  ;;  %v925_v2 = vsel %vm479_vm6, %v921_v40, %v923_v36 }
 0x18e   :  { %v928_v41 = vmul.f32 %v924_v63, %v1771_v14  ;;  %v929_v25 = vmul.f32 %v925_v2, %v1777_v60 }
 0x190   :  { %v935_v44 = vpop.permute.xlu0 %934  ;;  %v930_v9 = vadd.f32 %v928_v41, %v914_v18  ;;  %v931_v35 = vadd.f32 %v929_v25, %v915_v58 }
 0x191   :  { %v951_v46 = vpop.permute.xlu1 %950  ;;  %v940_v52 = vsel %vm479_vm6, %v935_v44, %v937_v62 }
 0x192   :  { %v944_v55 = vmul.f32 %v940_v52, %v1783_v6 }
 0x194   :  { %v939_v10 = vpop.permute.xlu0 %938  ;;  %v946_v44 = vadd.f32 %v944_v55, %v930_v9 }
 0x195   :  { %v955_v1 = vpop.permute.xlu1 %954  ;;  %v941_v17 = vsel %vm479_vm6, %v937_v62, %v939_v10 }
 0x196   :  { %v945_v48 = vmul.f32 %v941_v17, %v1791_v22 }
 0x198   :  { %v953_v23 = vpop.permute.xlu0 %952  ;;  %v947_v30 = vadd.f32 %v945_v48, %v931_v35 }
 0x199   :  { %v969_v4 = vpop.permute.xlu1 %968  ;;  %v956_v36 = vsel %vm531_vm7, %v951_v46, %v953_v23  ;;  %v957_v40 = vsel %vm531_vm7, %v953_v23, %v955_v1  ;;  %v2079_v46 = vld [vmem:[#allocation9_spill] sm:$0xff] }
 0x19a   :  { %v960_v14 = vmul.f32 %v956_v36, %v1795_v45  ;;  %v961_v60 = vmul.f32 %v957_v40, %v2075_v3 }
 0x19c   :  { %v967_v28 = vpop.permute.xlu0 %966  ;;  %v962_v34 = vadd.f32 %v960_v14, %v946_v44  ;;  %v963_v22 = vadd.f32 %v961_v60, %v947_v30 }
 0x19d   :  { %v972_v24 = vsel %vm531_vm7, %v967_v28, %v969_v4  ;;  %v983_v43 = vpop.permute.xlu1 %982 }
 0x19e   :  { %v976_v21 = vmul.f32 %v972_v24, %v2076_v8 }
 0x1a0   :  { %v971_v51 = vpop.permute.xlu0 %970  ;;  %v978_v20 = vadd.f32 %v976_v21, %v962_v34 }
 0x1a1   :  { %v973_v62 = vsel %vm531_vm7, %v969_v4, %v971_v51  ;;  %v987_v29 = vpop.permute.xlu1 %986 }
 0x1a2   :  { %v977_v6 = vmul.f32 %v973_v62, %v2077_v42 }
 0x1a4   :  { %v985_v47 = vpop.permute.xlu0 %984  ;;  %v979_v57 = vadd.f32 %v977_v6, %v963_v22 }
 0x1a5   :  { %v988_v15 = vsel %vm531_vm7, %v983_v43, %v985_v47  ;;  %v989_v45 = vsel %vm531_vm7, %v985_v47, %v987_v29 }
 0x1a6   :  { %v992_v37 = vmul.f32 %v988_v15, %v2078_v59  ;;  %v993_v10 = vmul.f32 %v989_v45, %v2079_v46 }
 0x1a8   :  { %v994_v16 = vadd.f32 %v992_v37, %v978_v20  ;;  %v995_v31 = vadd.f32 %v993_v10, %v979_v57 }
 0x1aa   :  { %1011 = vst [vmem:[%s1986_s3 + $0x10] sm:$0xff] %v994_v16  ;;  %1012 = vst [vmem:[%s1986_s3 + $0x18] sm:$0xff] %v995_v31 }
 0x1ab   :  { %1003 = vsyncpa [#allocation4], 1 }

</bundles_post_ra>
